<compile_context>
chip_gen: v6e
topology: v6e:2x2x1
jax: 0.10.0
libtpu: 0.0.40
codegen_flags: <defaults>
</compile_context>

<pallas_src>
import functools
import math

import numpy as np
import jax
import jax.numpy as jnp
from jax.experimental import pallas as pl
from jax.experimental.pallas import tpu as pltpu


# ----------------------------------------------------------------------------
# Fused kernel: projections + attention + mix + output projection.
# One grid step handles `block_b` batch elements (rows already flattened).
# ----------------------------------------------------------------------------
def mha_kernel(q_ref, k_ref, v_ref,
               wq_ref, bq_ref, wk_ref, bk_ref, wv_ref, bv_ref,
               wo_ref, bo_ref, sel_ref,
               out_ref, *, n_heads, d_keys, d_values, block_b, q_len, kv_len):
    H, Dk, Dv, Bb, L, S = n_heads, d_keys, d_values, block_b, q_len, kv_len

    xq = q_ref[...].astype(jnp.bfloat16)            # (Bb*L, F)
    xk = k_ref[...].astype(jnp.bfloat16)            # (Bb*S, F)
    xv = v_ref[...].astype(jnp.bfloat16)            # (Bb*S, F)

    # Lane-dense 2-D projections: one MXU matmul each. The softmax scale is
    # already folded into wq/bq by the wrapper.
    q = jnp.dot(xq, wq_ref[...], preferred_element_type=jnp.float32) + bq_ref[...]  # (Bb*L, H*Dk)
    k = jnp.dot(xk, wk_ref[...], preferred_element_type=jnp.float32) + bk_ref[...]  # (Bb*S, H*Dk)
    v = jnp.dot(xv, wv_ref[...], preferred_element_type=jnp.float32) + bv_ref[...]  # (Bb*S, H*Dv)
    qb = q.astype(jnp.bfloat16)
    kb = k.astype(jnp.bfloat16)
    vb = v.astype(jnp.bfloat16)

    # Per-(batch, head) attention scores — heads split only here, where the
    # score contraction requires it.  Stacked along sublanes so the softmax
    # (max / exp / sum / reciprocal) runs once over the whole block.
    # TODO(synk): flash-style KV tiling (online softmax) for large S.
    scores = []
    for b in range(Bb):
        for h in range(H):
            q_bh = qb[b * L:(b + 1) * L, h * Dk:(h + 1) * Dk]            # (L, Dk)
            k_bh = kb[b * S:(b + 1) * S, h * Dk:(h + 1) * Dk]            # (S, Dk)
            scores.append(jnp.einsum('le,se->ls', q_bh, k_bh,
                                     preferred_element_type=jnp.float32))
    scores = jnp.concatenate(scores, axis=0)                              # (Bb*H*L, S)

    scores = scores - jnp.max(scores, axis=-1, keepdims=True)
    e = jnp.exp(scores)
    probs = (e * pl.reciprocal(jnp.sum(e, axis=-1, keepdims=True),
                               approx=True)).astype(jnp.bfloat16)
    # TODO(synk): attention dropout (training mode) not implemented.

    # Attention outputs, rows ordered (b, h, l): o_flat[b*H*L + h*L + l] = o[b,h,l].
    o_rows = []
    for b in range(Bb):
        for h in range(H):
            a_bh = probs[(b * H + h) * L:(b * H + h + 1) * L, :]         # (L, S)
            v_bh = vb[b * S:(b + 1) * S, h * Dv:(h + 1) * Dv]            # (S, Dv)
            o_rows.append(jnp.dot(a_bh, v_bh, preferred_element_type=jnp.float32))
    o_flat = jnp.concatenate(o_rows, axis=0).astype(jnp.bfloat16)         # (Bb*H*L, Dv)

    # mix=True: out.transpose(2,1).contiguous().view(B, L, -1), i.e.
    #   mixed[b*L + l, c*Dv:(c+1)*Dv] = o_flat[b*H*L + l*H + c, :]
    # Implemented with precomputed one-hot bf16 selection matmuls (exact for
    # 0/1 operands), concatenated along lanes in registers — no VMEM scratch.
    mixed = jnp.concatenate(
        [jnp.dot(sel_ref[c], o_flat, preferred_element_type=jnp.float32)
         for c in range(H)], axis=1).astype(jnp.bfloat16)                 # (Bb*L, H*Dv)

    out_ref[...] = jnp.dot(mixed, wo_ref[...],
                           preferred_element_type=jnp.float32) + bo_ref[...]  # (Bb*L, F)


# ----------------------------------------------------------------------------
# Wrapper: weight pre-layout (bf16, scale folded), precomputed mix selection,
# flattened (rows, F) inputs, batch-blocked grid.
# ----------------------------------------------------------------------------
def attention_layer(queries, keys, values, p, *, n_heads, d_keys=16, d_values=16,
                    block_b=1):
    B, L, F = queries.shape
    _, S, _ = keys.shape
    H, Dk, Dv = n_heads, d_keys, d_values
    assert B % block_b == 0, "block_b must divide batch"
    Bb = block_b
    n_blocks = B // Bb
    scale = 1.0 / math.sqrt(Dk)

    # bf16 weights in plain 2-D (in, out) layout; softmax scale folded into wq/bq.
    wq = (p["wq"] * scale).astype(jnp.bfloat16)                 # (F, H*Dk)
    bq = (p["bq"] * scale).reshape(1, H * Dk).astype(jnp.float32)
    wk = p["wk"].astype(jnp.bfloat16)                           # (F, H*Dk)
    bk = p["bk"].reshape(1, H * Dk).astype(jnp.float32)
    wv = p["wv"].astype(jnp.bfloat16)                           # (F, H*Dv)
    bv = p["bv"].reshape(1, H * Dv).astype(jnp.float32)
    wo = p["wo"].astype(jnp.bfloat16)                           # (H*Dv, F)
    bo = p["bo"].reshape(1, F).astype(jnp.float32)

    # Precomputed one-hot selection constants for the mix=True view quirk:
    #   mixed[b*L + l, c*Dv:(c+1)*Dv] = o_flat[b*H*L + l*H + c, :]
    sel_np = np.zeros((H, Bb * L, Bb * H * L), np.float32)
    for c in range(H):
        for b in range(Bb):
            for l in range(L):
                sel_np[c, b * L + l, b * H * L + l * H + c] = 1.0
    sel = jnp.asarray(sel_np, jnp.bfloat16)

    # Flatten batch*seq rows so the kernel sees lane-dense 2-D blocks.
    q2 = queries.reshape(B * L, F)
    k2 = keys.reshape(B * S, F)
    v2 = values.reshape(B * S, F)

    const = lambda shape: pl.BlockSpec(shape, lambda i: (0,) * len(shape))
    kernel = functools.partial(mha_kernel, n_heads=H, d_keys=Dk, d_values=Dv,
                               block_b=Bb, q_len=L, kv_len=S)

    out2 = pl.pallas_call(
        kernel,
        out_shape=jax.ShapeDtypeStruct((B * L, F), jnp.float32),
        grid=(n_blocks,),
        in_specs=[
            pl.BlockSpec((Bb * L, F), lambda i: (i, 0)),        # queries rows
            pl.BlockSpec((Bb * S, F), lambda i: (i, 0)),        # keys rows
            pl.BlockSpec((Bb * S, F), lambda i: (i, 0)),        # values rows
            const((F, H * Dk)), const((1, H * Dk)),             # wq, bq
            const((F, H * Dk)), const((1, H * Dk)),             # wk, bk
            const((F, H * Dv)), const((1, H * Dv)),             # wv, bv
            const((H * Dv, F)), const((1, F)),                  # wo, bo
            const((H, Bb * L, Bb * H * L)),                     # mix selection
        ],
        out_specs=pl.BlockSpec((Bb * L, F), lambda i: (i, 0)),
        compiler_params=pltpu.CompilerParams(
            dimension_semantics=("parallel",)),
    )(q2, k2, v2, wq, bq, wk, bk, wv, bv, wo, bo, sel)
    return out2.reshape(B, L, F)


# ----------------------------------------------------------------------------
# Pure-JAX reference (mirrors the PyTorch AttentionLayer forward, eval mode).
# ----------------------------------------------------------------------------
def reference(queries, keys, values, p, *, n_heads, d_keys=16, d_values=16):
    B, L, F = queries.shape
    _, S, _ = keys.shape
    H, Dk, Dv = n_heads, d_keys, d_values
    q = (queries @ p["wq"] + p["bq"]).reshape(B, L, H, Dk)
    k = (keys @ p["wk"] + p["bk"]).reshape(B, S, H, Dk)
    v = (values @ p["wv"] + p["bv"]).reshape(B, S, H, Dv)
    scale = 1.0 / math.sqrt(Dk)
    scores = jnp.einsum("blhe,bshe->bhls", q, k) * scale
    A = jax.nn.softmax(scores, axis=-1)
    out = jnp.einsum("bhls,bshd->blhd", A, v)
    # mix=True: transpose(2,1).contiguous().view(B, L, -1)
    out = jnp.transpose(out, (0, 2, 1, 3)).reshape(B, L, H * Dv)
    return out @ p["wo"] + p["bo"]


# ----------------------------------------------------------------------------
# Deterministic parameter construction + run
# ----------------------------------------------------------------------------
def make_params(key, F, n_heads, d_keys, d_values):
    dk_tot, dv_tot = n_heads * d_keys, n_heads * d_values
    ks = jax.random.split(key, 8)
    s = 0.1
    return {
        "wq": s * jax.random.normal(ks[0], (F, dk_tot), jnp.float32),
        "bq": s * jax.random.normal(ks[1], (dk_tot,), jnp.float32),
        "wk": s * jax.random.normal(ks[2], (F, dk_tot), jnp.float32),
        "bk": s * jax.random.normal(ks[3], (dk_tot,), jnp.float32),
        "wv": s * jax.random.normal(ks[4], (F, dv_tot), jnp.float32),
        "bv": s * jax.random.normal(ks[5], (dv_tot,), jnp.float32),
        "wo": s * jax.random.normal(ks[6], (dv_tot, F), jnp.float32),
        "bo": s * jax.random.normal(ks[7], (F,), jnp.float32),
    }


if __name__ == "__main__":
    # Small shapes consistent with the module; block_b=2 gives 2 batch elements
    # per grid step and a 2-step grid (both v7x TensorCores busy).
    B, L, F = 4, 8, 32
    n_heads, d_keys, d_values = 4, 16, 16
    block_b = 2

    key = jax.random.PRNGKey(0)
    kq, kk, kv, kp = jax.random.split(key, 4)
    queries = jax.random.normal(kq, (B, L, F), jnp.float32)
    keys = jax.random.normal(kk, (B, L, F), jnp.float32)
    values = jax.random.normal(kv, (B, L, F), jnp.float32)
    params = make_params(kp, F, n_heads, d_keys, d_values)

    out = attention_layer(queries, keys, values, params,
                          n_heads=n_heads, d_keys=d_keys, d_values=d_values,
                          block_b=block_b)
    out = jax.block_until_ready(out)

    ref = jax.block_until_ready(
        reference(queries, keys, values, params,
                  n_heads=n_heads, d_keys=d_keys, d_values=d_values))

    assert out.shape == (B, L, F)
    err = jnp.max(jnp.abs(out - ref))
    assert jnp.allclose(out, ref, rtol=2e-2, atol=2e-2), f"max abs err {err}"
    print("KERNEL_OK")
</pallas_src>

<mosaic_0001>
module attributes {stable_mosaic.version = 11 : i64} {
  func.func @mha_kernel(%arg0: i32, %arg1: memref<16x32xf32, #tpu.memory_space<vmem>>, %arg2: memref<16x32xf32, #tpu.memory_space<vmem>>, %arg3: memref<16x32xf32, #tpu.memory_space<vmem>>, %arg4: memref<32x64xbf16, #tpu.memory_space<vmem>>, %arg5: memref<1x64xf32, #tpu.memory_space<vmem>>, %arg6: memref<32x64xbf16, #tpu.memory_space<vmem>>, %arg7: memref<1x64xf32, #tpu.memory_space<vmem>>, %arg8: memref<32x64xbf16, #tpu.memory_space<vmem>>, %arg9: memref<1x64xf32, #tpu.memory_space<vmem>>, %arg10: memref<64x32xbf16, #tpu.memory_space<vmem>>, %arg11: memref<1x32xf32, #tpu.memory_space<vmem>>, %arg12: memref<4x16x64xbf16, #tpu.memory_space<vmem>>, %arg13: memref<16x32xf32, #tpu.memory_space<vmem>>) attributes {dimension_semantics = [#tpu.dimension_semantics<parallel>], iteration_bounds = array<i64: 2>, scalar_prefetch = 0 : i64, scratch_operands = 0 : i64, tpu.core_type = #tpu.core_type<tc>, window_params = [{transform_indices = @transform_0, window_bounds = array<i64: 16, 32>}, {transform_indices = @transform_1, window_bounds = array<i64: 16, 32>}, {transform_indices = @transform_2, window_bounds = array<i64: 16, 32>}, {pipeline_mode = #tpu.pipeline_mode<synchronous>, transform_indices = @transform_3, window_bounds = array<i64: 32, 64>}, {pipeline_mode = #tpu.pipeline_mode<synchronous>, transform_indices = @transform_4, window_bounds = array<i64: 1, 64>}, {pipeline_mode = #tpu.pipeline_mode<synchronous>, transform_indices = @transform_5, window_bounds = array<i64: 32, 64>}, {pipeline_mode = #tpu.pipeline_mode<synchronous>, transform_indices = @transform_6, window_bounds = array<i64: 1, 64>}, {pipeline_mode = #tpu.pipeline_mode<synchronous>, transform_indices = @transform_7, window_bounds = array<i64: 32, 64>}, {pipeline_mode = #tpu.pipeline_mode<synchronous>, transform_indices = @transform_8, window_bounds = array<i64: 1, 64>}, {pipeline_mode = #tpu.pipeline_mode<synchronous>, transform_indices = @transform_9, window_bounds = array<i64: 64, 32>}, {pipeline_mode = #tpu.pipeline_mode<synchronous>, transform_indices = @transform_10, window_bounds = array<i64: 1, 32>}, {pipeline_mode = #tpu.pipeline_mode<synchronous>, transform_indices = @transform_11, window_bounds = array<i64: 4, 16, 64>}, {transform_indices = @transform_12, window_bounds = array<i64: 16, 32>}]} {
    %c0 = arith.constant 0 : index
    %c0_0 = arith.constant 0 : index
    %0 = vector.load %arg1[%c0, %c0_0] : memref<16x32xf32, #tpu.memory_space<vmem>>, vector<16x32xf32>
    %1 = arith.truncf %0 : vector<16x32xf32> to vector<16x32xbf16>
    %c0_1 = arith.constant 0 : index
    %c0_2 = arith.constant 0 : index
    %2 = vector.load %arg2[%c0_1, %c0_2] : memref<16x32xf32, #tpu.memory_space<vmem>>, vector<16x32xf32>
    %3 = arith.truncf %2 : vector<16x32xf32> to vector<16x32xbf16>
    %c0_3 = arith.constant 0 : index
    %c0_4 = arith.constant 0 : index
    %4 = vector.load %arg3[%c0_3, %c0_4] : memref<16x32xf32, #tpu.memory_space<vmem>>, vector<16x32xf32>
    %5 = arith.truncf %4 : vector<16x32xf32> to vector<16x32xbf16>
    %c0_5 = arith.constant 0 : index
    %c0_6 = arith.constant 0 : index
    %6 = vector.load %arg4[%c0_5, %c0_6] : memref<32x64xbf16, #tpu.memory_space<vmem>>, vector<32x64xbf16>
    %cst = arith.constant dense<0.000000e+00> : vector<16x64xf32>
    %7 = tpu.matmul %1, %6, %cst {dimension_numbers = #tpu.dot_dimension_numbers<[1], [0], [0], [1], [0, 0, 1, 1], [], []>} : vector<16x32xbf16>, vector<32x64xbf16>, vector<16x64xf32> -> vector<16x64xf32>
    %c0_7 = arith.constant 0 : index
    %c0_8 = arith.constant 0 : index
    %8 = vector.load %arg5[%c0_7, %c0_8] : memref<1x64xf32, #tpu.memory_space<vmem>>, vector<1x64xf32>
    %9 = vector.broadcast %8 : vector<1x64xf32> to vector<16x64xf32>
    %10 = arith.addf %7, %9 : vector<16x64xf32>
    %c0_9 = arith.constant 0 : index
    %c0_10 = arith.constant 0 : index
    %11 = vector.load %arg6[%c0_9, %c0_10] : memref<32x64xbf16, #tpu.memory_space<vmem>>, vector<32x64xbf16>
    %cst_11 = arith.constant dense<0.000000e+00> : vector<16x64xf32>
    %12 = tpu.matmul %3, %11, %cst_11 {dimension_numbers = #tpu.dot_dimension_numbers<[1], [0], [0], [1], [0, 0, 1, 1], [], []>} : vector<16x32xbf16>, vector<32x64xbf16>, vector<16x64xf32> -> vector<16x64xf32>
    %c0_12 = arith.constant 0 : index
    %c0_13 = arith.constant 0 : index
    %13 = vector.load %arg7[%c0_12, %c0_13] : memref<1x64xf32, #tpu.memory_space<vmem>>, vector<1x64xf32>
    %14 = vector.broadcast %13 : vector<1x64xf32> to vector<16x64xf32>
    %15 = arith.addf %12, %14 : vector<16x64xf32>
    %c0_14 = arith.constant 0 : index
    %c0_15 = arith.constant 0 : index
    %16 = vector.load %arg8[%c0_14, %c0_15] : memref<32x64xbf16, #tpu.memory_space<vmem>>, vector<32x64xbf16>
    %cst_16 = arith.constant dense<0.000000e+00> : vector<16x64xf32>
    %17 = tpu.matmul %5, %16, %cst_16 {dimension_numbers = #tpu.dot_dimension_numbers<[1], [0], [0], [1], [0, 0, 1, 1], [], []>} : vector<16x32xbf16>, vector<32x64xbf16>, vector<16x64xf32> -> vector<16x64xf32>
    %c0_17 = arith.constant 0 : index
    %c0_18 = arith.constant 0 : index
    %18 = vector.load %arg9[%c0_17, %c0_18] : memref<1x64xf32, #tpu.memory_space<vmem>>, vector<1x64xf32>
    %19 = vector.broadcast %18 : vector<1x64xf32> to vector<16x64xf32>
    %20 = arith.addf %17, %19 : vector<16x64xf32>
    %21 = arith.truncf %10 : vector<16x64xf32> to vector<16x64xbf16>
    %22 = arith.truncf %15 : vector<16x64xf32> to vector<16x64xbf16>
    %23 = arith.truncf %20 : vector<16x64xf32> to vector<16x64xbf16>
    %24 = vector.extract_strided_slice %21 {offsets = [0, 0], sizes = [8, 16], strides = [1, 1]} : vector<16x64xbf16> to vector<8x16xbf16>
    %25 = vector.extract_strided_slice %22 {offsets = [0, 0], sizes = [8, 16], strides = [1, 1]} : vector<16x64xbf16> to vector<8x16xbf16>
    "tpu.trace_start"() <{level = 10 : i32, message = "le,se->ls"}> : () -> ()
    %cst_19 = arith.constant dense<0.000000e+00> : vector<8x8xf32>
    %26 = tpu.matmul %24, %25, %cst_19 {dimension_numbers = #tpu.dot_dimension_numbers<[1], [1], [0], [0], [0, 0, 1, 0], [], []>} : vector<8x16xbf16>, vector<8x16xbf16>, vector<8x8xf32> -> vector<8x8xf32>
    "tpu.trace_stop"() : () -> ()
    %27 = vector.extract_strided_slice %21 {offsets = [0, 16], sizes = [8, 16], strides = [1, 1]} : vector<16x64xbf16> to vector<8x16xbf16>
    %28 = vector.extract_strided_slice %22 {offsets = [0, 16], sizes = [8, 16], strides = [1, 1]} : vector<16x64xbf16> to vector<8x16xbf16>
    "tpu.trace_start"() <{level = 10 : i32, message = "le,se->ls"}> : () -> ()
    %cst_20 = arith.constant dense<0.000000e+00> : vector<8x8xf32>
    %29 = tpu.matmul %27, %28, %cst_20 {dimension_numbers = #tpu.dot_dimension_numbers<[1], [1], [0], [0], [0, 0, 1, 0], [], []>} : vector<8x16xbf16>, vector<8x16xbf16>, vector<8x8xf32> -> vector<8x8xf32>
    "tpu.trace_stop"() : () -> ()
    %30 = vector.extract_strided_slice %21 {offsets = [0, 32], sizes = [8, 16], strides = [1, 1]} : vector<16x64xbf16> to vector<8x16xbf16>
    %31 = vector.extract_strided_slice %22 {offsets = [0, 32], sizes = [8, 16], strides = [1, 1]} : vector<16x64xbf16> to vector<8x16xbf16>
    "tpu.trace_start"() <{level = 10 : i32, message = "le,se->ls"}> : () -> ()
    %cst_21 = arith.constant dense<0.000000e+00> : vector<8x8xf32>
    %32 = tpu.matmul %30, %31, %cst_21 {dimension_numbers = #tpu.dot_dimension_numbers<[1], [1], [0], [0], [0, 0, 1, 0], [], []>} : vector<8x16xbf16>, vector<8x16xbf16>, vector<8x8xf32> -> vector<8x8xf32>
    "tpu.trace_stop"() : () -> ()
    %33 = vector.extract_strided_slice %21 {offsets = [0, 48], sizes = [8, 16], strides = [1, 1]} : vector<16x64xbf16> to vector<8x16xbf16>
    %34 = vector.extract_strided_slice %22 {offsets = [0, 48], sizes = [8, 16], strides = [1, 1]} : vector<16x64xbf16> to vector<8x16xbf16>
    "tpu.trace_start"() <{level = 10 : i32, message = "le,se->ls"}> : () -> ()
    %cst_22 = arith.constant dense<0.000000e+00> : vector<8x8xf32>
    %35 = tpu.matmul %33, %34, %cst_22 {dimension_numbers = #tpu.dot_dimension_numbers<[1], [1], [0], [0], [0, 0, 1, 0], [], []>} : vector<8x16xbf16>, vector<8x16xbf16>, vector<8x8xf32> -> vector<8x8xf32>
    "tpu.trace_stop"() : () -> ()
    %36 = vector.extract_strided_slice %21 {offsets = [8, 0], sizes = [8, 16], strides = [1, 1]} : vector<16x64xbf16> to vector<8x16xbf16>
    %37 = vector.extract_strided_slice %22 {offsets = [8, 0], sizes = [8, 16], strides = [1, 1]} : vector<16x64xbf16> to vector<8x16xbf16>
    "tpu.trace_start"() <{level = 10 : i32, message = "le,se->ls"}> : () -> ()
    %cst_23 = arith.constant dense<0.000000e+00> : vector<8x8xf32>
    %38 = tpu.matmul %36, %37, %cst_23 {dimension_numbers = #tpu.dot_dimension_numbers<[1], [1], [0], [0], [0, 0, 1, 0], [], []>} : vector<8x16xbf16>, vector<8x16xbf16>, vector<8x8xf32> -> vector<8x8xf32>
    "tpu.trace_stop"() : () -> ()
    %39 = vector.extract_strided_slice %21 {offsets = [8, 16], sizes = [8, 16], strides = [1, 1]} : vector<16x64xbf16> to vector<8x16xbf16>
    %40 = vector.extract_strided_slice %22 {offsets = [8, 16], sizes = [8, 16], strides = [1, 1]} : vector<16x64xbf16> to vector<8x16xbf16>
    "tpu.trace_start"() <{level = 10 : i32, message = "le,se->ls"}> : () -> ()
    %cst_24 = arith.constant dense<0.000000e+00> : vector<8x8xf32>
    %41 = tpu.matmul %39, %40, %cst_24 {dimension_numbers = #tpu.dot_dimension_numbers<[1], [1], [0], [0], [0, 0, 1, 0], [], []>} : vector<8x16xbf16>, vector<8x16xbf16>, vector<8x8xf32> -> vector<8x8xf32>
    "tpu.trace_stop"() : () -> ()
    %42 = vector.extract_strided_slice %21 {offsets = [8, 32], sizes = [8, 16], strides = [1, 1]} : vector<16x64xbf16> to vector<8x16xbf16>
    %43 = vector.extract_strided_slice %22 {offsets = [8, 32], sizes = [8, 16], strides = [1, 1]} : vector<16x64xbf16> to vector<8x16xbf16>
    "tpu.trace_start"() <{level = 10 : i32, message = "le,se->ls"}> : () -> ()
    %cst_25 = arith.constant dense<0.000000e+00> : vector<8x8xf32>
    %44 = tpu.matmul %42, %43, %cst_25 {dimension_numbers = #tpu.dot_dimension_numbers<[1], [1], [0], [0], [0, 0, 1, 0], [], []>} : vector<8x16xbf16>, vector<8x16xbf16>, vector<8x8xf32> -> vector<8x8xf32>
    "tpu.trace_stop"() : () -> ()
    %45 = vector.extract_strided_slice %21 {offsets = [8, 48], sizes = [8, 16], strides = [1, 1]} : vector<16x64xbf16> to vector<8x16xbf16>
    %46 = vector.extract_strided_slice %22 {offsets = [8, 48], sizes = [8, 16], strides = [1, 1]} : vector<16x64xbf16> to vector<8x16xbf16>
    "tpu.trace_start"() <{level = 10 : i32, message = "le,se->ls"}> : () -> ()
    %cst_26 = arith.constant dense<0.000000e+00> : vector<8x8xf32>
    %47 = tpu.matmul %45, %46, %cst_26 {dimension_numbers = #tpu.dot_dimension_numbers<[1], [1], [0], [0], [0, 0, 1, 0], [], []>} : vector<8x16xbf16>, vector<8x16xbf16>, vector<8x8xf32> -> vector<8x8xf32>
    "tpu.trace_stop"() : () -> ()
    %48 = tpu.concatenate %26, %29, %32, %35, %38, %41, %44, %47 in 0 : vector<8x8xf32>, vector<8x8xf32>, vector<8x8xf32>, vector<8x8xf32>, vector<8x8xf32>, vector<8x8xf32>, vector<8x8xf32>, vector<8x8xf32> -> vector<64x8xf32>
    %cst_27 = arith.constant dense<0xFF800000> : vector<64xf32>
    %49 = vector.multi_reduction <maximumf>, %48, %cst_27 [1] : vector<64x8xf32> to vector<64xf32>
    %50 = vector.shape_cast %49 : vector<64xf32> to vector<64x1xf32>
    %51 = vector.broadcast %50 : vector<64x1xf32> to vector<64x8xf32>
    %52 = arith.subf %48, %51 : vector<64x8xf32>
    %53 = math.exp %52 : vector<64x8xf32>
    %cst_28 = arith.constant dense<0.000000e+00> : vector<64xf32>
    %54 = vector.multi_reduction <add>, %53, %cst_28 [1] : vector<64x8xf32> to vector<64xf32>
    %55 = vector.shape_cast %54 : vector<64xf32> to vector<64x1xf32>
    %56 = tpu.reciprocal %55 {approx = true} : vector<64x1xf32> -> vector<64x1xf32>
    %57 = vector.broadcast %56 : vector<64x1xf32> to vector<64x8xf32>
    %58 = arith.mulf %53, %57 : vector<64x8xf32>
    %59 = arith.truncf %58 : vector<64x8xf32> to vector<64x8xbf16>
    %60 = vector.extract_strided_slice %59 {offsets = [0, 0], sizes = [8, 8], strides = [1, 1]} : vector<64x8xbf16> to vector<8x8xbf16>
    %61 = vector.extract_strided_slice %23 {offsets = [0, 0], sizes = [8, 16], strides = [1, 1]} : vector<16x64xbf16> to vector<8x16xbf16>
    %cst_29 = arith.constant dense<0.000000e+00> : vector<8x16xf32>
    %62 = tpu.matmul %60, %61, %cst_29 {dimension_numbers = #tpu.dot_dimension_numbers<[1], [0], [0], [1], [0, 0, 1, 1], [], []>} : vector<8x8xbf16>, vector<8x16xbf16>, vector<8x16xf32> -> vector<8x16xf32>
    %63 = vector.extract_strided_slice %59 {offsets = [8, 0], sizes = [8, 8], strides = [1, 1]} : vector<64x8xbf16> to vector<8x8xbf16>
    %64 = vector.extract_strided_slice %23 {offsets = [0, 16], sizes = [8, 16], strides = [1, 1]} : vector<16x64xbf16> to vector<8x16xbf16>
    %cst_30 = arith.constant dense<0.000000e+00> : vector<8x16xf32>
    %65 = tpu.matmul %63, %64, %cst_30 {dimension_numbers = #tpu.dot_dimension_numbers<[1], [0], [0], [1], [0, 0, 1, 1], [], []>} : vector<8x8xbf16>, vector<8x16xbf16>, vector<8x16xf32> -> vector<8x16xf32>
    %66 = vector.extract_strided_slice %59 {offsets = [16, 0], sizes = [8, 8], strides = [1, 1]} : vector<64x8xbf16> to vector<8x8xbf16>
    %67 = vector.extract_strided_slice %23 {offsets = [0, 32], sizes = [8, 16], strides = [1, 1]} : vector<16x64xbf16> to vector<8x16xbf16>
    %cst_31 = arith.constant dense<0.000000e+00> : vector<8x16xf32>
    %68 = tpu.matmul %66, %67, %cst_31 {dimension_numbers = #tpu.dot_dimension_numbers<[1], [0], [0], [1], [0, 0, 1, 1], [], []>} : vector<8x8xbf16>, vector<8x16xbf16>, vector<8x16xf32> -> vector<8x16xf32>
    %69 = vector.extract_strided_slice %59 {offsets = [24, 0], sizes = [8, 8], strides = [1, 1]} : vector<64x8xbf16> to vector<8x8xbf16>
    %70 = vector.extract_strided_slice %23 {offsets = [0, 48], sizes = [8, 16], strides = [1, 1]} : vector<16x64xbf16> to vector<8x16xbf16>
    %cst_32 = arith.constant dense<0.000000e+00> : vector<8x16xf32>
    %71 = tpu.matmul %69, %70, %cst_32 {dimension_numbers = #tpu.dot_dimension_numbers<[1], [0], [0], [1], [0, 0, 1, 1], [], []>} : vector<8x8xbf16>, vector<8x16xbf16>, vector<8x16xf32> -> vector<8x16xf32>
    %72 = vector.extract_strided_slice %59 {offsets = [32, 0], sizes = [8, 8], strides = [1, 1]} : vector<64x8xbf16> to vector<8x8xbf16>
    %73 = vector.extract_strided_slice %23 {offsets = [8, 0], sizes = [8, 16], strides = [1, 1]} : vector<16x64xbf16> to vector<8x16xbf16>
    %cst_33 = arith.constant dense<0.000000e+00> : vector<8x16xf32>
    %74 = tpu.matmul %72, %73, %cst_33 {dimension_numbers = #tpu.dot_dimension_numbers<[1], [0], [0], [1], [0, 0, 1, 1], [], []>} : vector<8x8xbf16>, vector<8x16xbf16>, vector<8x16xf32> -> vector<8x16xf32>
    %75 = vector.extract_strided_slice %59 {offsets = [40, 0], sizes = [8, 8], strides = [1, 1]} : vector<64x8xbf16> to vector<8x8xbf16>
    %76 = vector.extract_strided_slice %23 {offsets = [8, 16], sizes = [8, 16], strides = [1, 1]} : vector<16x64xbf16> to vector<8x16xbf16>
    %cst_34 = arith.constant dense<0.000000e+00> : vector<8x16xf32>
    %77 = tpu.matmul %75, %76, %cst_34 {dimension_numbers = #tpu.dot_dimension_numbers<[1], [0], [0], [1], [0, 0, 1, 1], [], []>} : vector<8x8xbf16>, vector<8x16xbf16>, vector<8x16xf32> -> vector<8x16xf32>
    %78 = vector.extract_strided_slice %59 {offsets = [48, 0], sizes = [8, 8], strides = [1, 1]} : vector<64x8xbf16> to vector<8x8xbf16>
    %79 = vector.extract_strided_slice %23 {offsets = [8, 32], sizes = [8, 16], strides = [1, 1]} : vector<16x64xbf16> to vector<8x16xbf16>
    %cst_35 = arith.constant dense<0.000000e+00> : vector<8x16xf32>
    %80 = tpu.matmul %78, %79, %cst_35 {dimension_numbers = #tpu.dot_dimension_numbers<[1], [0], [0], [1], [0, 0, 1, 1], [], []>} : vector<8x8xbf16>, vector<8x16xbf16>, vector<8x16xf32> -> vector<8x16xf32>
    %81 = vector.extract_strided_slice %59 {offsets = [56, 0], sizes = [8, 8], strides = [1, 1]} : vector<64x8xbf16> to vector<8x8xbf16>
    %82 = vector.extract_strided_slice %23 {offsets = [8, 48], sizes = [8, 16], strides = [1, 1]} : vector<16x64xbf16> to vector<8x16xbf16>
    %cst_36 = arith.constant dense<0.000000e+00> : vector<8x16xf32>
    %83 = tpu.matmul %81, %82, %cst_36 {dimension_numbers = #tpu.dot_dimension_numbers<[1], [0], [0], [1], [0, 0, 1, 1], [], []>} : vector<8x8xbf16>, vector<8x16xbf16>, vector<8x16xf32> -> vector<8x16xf32>
    %84 = tpu.concatenate %62, %65, %68, %71, %74, %77, %80, %83 in 0 : vector<8x16xf32>, vector<8x16xf32>, vector<8x16xf32>, vector<8x16xf32>, vector<8x16xf32>, vector<8x16xf32>, vector<8x16xf32>, vector<8x16xf32> -> vector<64x16xf32>
    %85 = arith.truncf %84 : vector<64x16xf32> to vector<64x16xbf16>
    %c0_37 = arith.constant 0 : index
    %c0_38 = arith.constant 0 : index
    %c0_39 = arith.constant 0 : index
    %86 = vector.load %arg12[%c0_37, %c0_38, %c0_39] : memref<4x16x64xbf16, #tpu.memory_space<vmem>>, vector<1x16x64xbf16>
    %87 = vector.shape_cast %86 : vector<1x16x64xbf16> to vector<16x64xbf16>
    %cst_40 = arith.constant dense<0.000000e+00> : vector<16x16xf32>
    %88 = tpu.matmul %87, %85, %cst_40 {dimension_numbers = #tpu.dot_dimension_numbers<[1], [0], [0], [1], [0, 0, 1, 1], [], []>} : vector<16x64xbf16>, vector<64x16xbf16>, vector<16x16xf32> -> vector<16x16xf32>
    %c1 = arith.constant 1 : index
    %c0_41 = arith.constant 0 : index
    %c0_42 = arith.constant 0 : index
    %89 = vector.load %arg12[%c1, %c0_41, %c0_42] : memref<4x16x64xbf16, #tpu.memory_space<vmem>>, vector<1x16x64xbf16>
    %90 = vector.shape_cast %89 : vector<1x16x64xbf16> to vector<16x64xbf16>
    %cst_43 = arith.constant dense<0.000000e+00> : vector<16x16xf32>
    %91 = tpu.matmul %90, %85, %cst_43 {dimension_numbers = #tpu.dot_dimension_numbers<[1], [0], [0], [1], [0, 0, 1, 1], [], []>} : vector<16x64xbf16>, vector<64x16xbf16>, vector<16x16xf32> -> vector<16x16xf32>
    %c2 = arith.constant 2 : index
    %c0_44 = arith.constant 0 : index
    %c0_45 = arith.constant 0 : index
    %92 = vector.load %arg12[%c2, %c0_44, %c0_45] : memref<4x16x64xbf16, #tpu.memory_space<vmem>>, vector<1x16x64xbf16>
    %93 = vector.shape_cast %92 : vector<1x16x64xbf16> to vector<16x64xbf16>
    %cst_46 = arith.constant dense<0.000000e+00> : vector<16x16xf32>
    %94 = tpu.matmul %93, %85, %cst_46 {dimension_numbers = #tpu.dot_dimension_numbers<[1], [0], [0], [1], [0, 0, 1, 1], [], []>} : vector<16x64xbf16>, vector<64x16xbf16>, vector<16x16xf32> -> vector<16x16xf32>
    %c3 = arith.constant 3 : index
    %c0_47 = arith.constant 0 : index
    %c0_48 = arith.constant 0 : index
    %95 = vector.load %arg12[%c3, %c0_47, %c0_48] : memref<4x16x64xbf16, #tpu.memory_space<vmem>>, vector<1x16x64xbf16>
    %96 = vector.shape_cast %95 : vector<1x16x64xbf16> to vector<16x64xbf16>
    %cst_49 = arith.constant dense<0.000000e+00> : vector<16x16xf32>
    %97 = tpu.matmul %96, %85, %cst_49 {dimension_numbers = #tpu.dot_dimension_numbers<[1], [0], [0], [1], [0, 0, 1, 1], [], []>} : vector<16x64xbf16>, vector<64x16xbf16>, vector<16x16xf32> -> vector<16x16xf32>
    %98 = tpu.concatenate %88, %91, %94, %97 in 1 : vector<16x16xf32>, vector<16x16xf32>, vector<16x16xf32>, vector<16x16xf32> -> vector<16x64xf32>
    %99 = arith.truncf %98 : vector<16x64xf32> to vector<16x64xbf16>
    %c0_50 = arith.constant 0 : index
    %c0_51 = arith.constant 0 : index
    %100 = vector.load %arg10[%c0_50, %c0_51] : memref<64x32xbf16, #tpu.memory_space<vmem>>, vector<64x32xbf16>
    %cst_52 = arith.constant dense<0.000000e+00> : vector<16x32xf32>
    %101 = tpu.matmul %99, %100, %cst_52 {dimension_numbers = #tpu.dot_dimension_numbers<[1], [0], [0], [1], [0, 0, 1, 1], [], []>} : vector<16x64xbf16>, vector<64x32xbf16>, vector<16x32xf32> -> vector<16x32xf32>
    %c0_53 = arith.constant 0 : index
    %c0_54 = arith.constant 0 : index
    %102 = vector.load %arg11[%c0_53, %c0_54] : memref<1x32xf32, #tpu.memory_space<vmem>>, vector<1x32xf32>
    %103 = vector.broadcast %102 : vector<1x32xf32> to vector<16x32xf32>
    %104 = arith.addf %101, %103 : vector<16x32xf32>
    %c0_55 = arith.constant 0 : index
    %c0_56 = arith.constant 0 : index
    %105 = vector.load %arg13[%c0_55, %c0_56] : memref<16x32xf32, #tpu.memory_space<vmem>>, vector<16x32xf32>
    tpu.vector_store %arg13[%c0_55, %c0_56], %104 {strides = array<i32>} : memref<16x32xf32, #tpu.memory_space<vmem>>, vector<16x32xf32>,
    return
  }
  func.func @transform_0(%arg0: i32) -> (i32, i32) {
    %c0_i32 = arith.constant 0 : i32
    %c0_i32_0 = arith.constant 0 : i32
    return %arg0, %c0_i32 : i32, i32
  }
  func.func @transform_1(%arg0: i32) -> (i32, i32) {
    %c0_i32 = arith.constant 0 : i32
    %c0_i32_0 = arith.constant 0 : i32
    return %arg0, %c0_i32 : i32, i32
  }
  func.func @transform_2(%arg0: i32) -> (i32, i32) {
    %c0_i32 = arith.constant 0 : i32
    %c0_i32_0 = arith.constant 0 : i32
    return %arg0, %c0_i32 : i32, i32
  }
  func.func @transform_3(%arg0: i32) -> (i32, i32) {
    %c0_i32 = arith.constant 0 : i32
    %c0_i32_0 = arith.constant 0 : i32
    %c0_i32_1 = arith.constant 0 : i32
    return %c0_i32, %c0_i32_0 : i32, i32
  }
  func.func @transform_4(%arg0: i32) -> (i32, i32) {
    %c0_i32 = arith.constant 0 : i32
    %c0_i32_0 = arith.constant 0 : i32
    %c0_i32_1 = arith.constant 0 : i32
    return %c0_i32, %c0_i32_0 : i32, i32
  }
  func.func @transform_5(%arg0: i32) -> (i32, i32) {
    %c0_i32 = arith.constant 0 : i32
    %c0_i32_0 = arith.constant 0 : i32
    %c0_i32_1 = arith.constant 0 : i32
    return %c0_i32, %c0_i32_0 : i32, i32
  }
  func.func @transform_6(%arg0: i32) -> (i32, i32) {
    %c0_i32 = arith.constant 0 : i32
    %c0_i32_0 = arith.constant 0 : i32
    %c0_i32_1 = arith.constant 0 : i32
    return %c0_i32, %c0_i32_0 : i32, i32
  }
  func.func @transform_7(%arg0: i32) -> (i32, i32) {
    %c0_i32 = arith.constant 0 : i32
    %c0_i32_0 = arith.constant 0 : i32
    %c0_i32_1 = arith.constant 0 : i32
    return %c0_i32, %c0_i32_0 : i32, i32
  }
  func.func @transform_8(%arg0: i32) -> (i32, i32) {
    %c0_i32 = arith.constant 0 : i32
    %c0_i32_0 = arith.constant 0 : i32
    %c0_i32_1 = arith.constant 0 : i32
    return %c0_i32, %c0_i32_0 : i32, i32
  }
  func.func @transform_9(%arg0: i32) -> (i32, i32) {
    %c0_i32 = arith.constant 0 : i32
    %c0_i32_0 = arith.constant 0 : i32
    %c0_i32_1 = arith.constant 0 : i32
    return %c0_i32, %c0_i32_0 : i32, i32
  }
  func.func @transform_10(%arg0: i32) -> (i32, i32) {
    %c0_i32 = arith.constant 0 : i32
    %c0_i32_0 = arith.constant 0 : i32
    %c0_i32_1 = arith.constant 0 : i32
    return %c0_i32, %c0_i32_0 : i32, i32
  }
  func.func @transform_11(%arg0: i32) -> (i32, i32, i32) {
    %c0_i32 = arith.constant 0 : i32
    %c0_i32_0 = arith.constant 0 : i32
    %c0_i32_1 = arith.constant 0 : i32
    %c0_i32_2 = arith.constant 0 : i32
    return %c0_i32, %c0_i32_0, %c0_i32_1 : i32, i32, i32
  }
  func.func @transform_12(%arg0: i32) -> (i32, i32) {
    %c0_i32 = arith.constant 0 : i32
    %c0_i32_0 = arith.constant 0 : i32
    return %arg0, %c0_i32 : i32, i32
  }
}

</mosaic_0001>

<bundles_post_ra>
// kernel: tpu_custom_call.1
= control target key start
LH: loop header
LB: loop body
LE: loop exit
PB: predicated region body
PF: predicated region fallthrough
CT: control target
= control target key end

     0   :  { %s3649_s0 = inlined_call_operand.vmem [shape: f32[32,32], index: 0, kind: input, shape index: {}]   ;;  %s3650_s1 = inlined_call_operand.hbm [shape: f32[32,32], index: 1, kind: input, shape index: {}]   ;;  %s3651_s2 = inlined_call_operand.hbm [shape: f32[32,32], index: 2, kind: input, shape index: {}]   ;;  %s3652_s3 = inlined_call_operand.hbm [shape: bf16[32,64], index: 3, kind: input, shape index: {}]   ;;  %s3653_s4 = inlined_call_operand.hbm [shape: f32[1,64], index: 4, kind: input, shape index: {}]   ;;  %s3654_s5 = inlined_call_operand.hbm [shape: bf16[32,64], index: 5, kind: input, shape index: {}]   ;;  %s3655_s6 = inlined_call_operand.hbm [shape: f32[1,64], index: 6, kind: input, shape index: {}]   ;;  %s3656_s7 = inlined_call_operand.hbm [shape: bf16[32,64], index: 7, kind: input, shape index: {}]   ;;  %s3657_s8 = inlined_call_operand.hbm [shape: f32[1,64], index: 8, kind: input, shape index: {}]   ;;  %s3658_s9 = inlined_call_operand.vmem [shape: bf16[64,32], index: 9, kind: input, shape index: {}]   ;;  %s3659_s10 = inlined_call_operand.vmem [shape: f32[1,32], index: 10, kind: input, shape index: {}]   ;;  %s3660_s11 = inlined_call_operand.vmem [shape: bf16[4,16,64], index: 11, kind: input, shape index: {}]   ;;  %s3661_s12 = inlined_call_operand.hbm [shape: f32[32,32], index: 12, kind: output, shape index: {}]  }
   0x1   :  { %3669 = sst [smem:[#allocation25_spill]] %s3650_s1 }
   0x2   :  { %3670 = sst [smem:[#allocation26_spill]] %s3652_s3 }
   0x3   :  { %3671 = sst [smem:[#allocation27_spill]] %s3653_s4 }
   0x4   :  { %3672 = sst [smem:[#allocation28_spill]] %s3654_s5 }
   0x5   :  { %3673 = sst [smem:[#allocation29_spill]] %s3655_s6 }
   0x6   :  { %3674 = sst [smem:[#allocation30_spill]] %s3656_s7 }
   0x7   :  { %3675 = sst [smem:[#allocation31_spill]] %s3657_s8 }
   0x8   :  { %3676 = sst [smem:[#allocation32_spill]] %s3661_s12 }
   0x9   :  { %17 = vsyncpa [#allocation3], 0 }
   0xa   :  { %19 = vsyncpa [#allocation3 + $0x1], 0 }
   0xb   :  { %20 = vsyncpa [#allocation6], 0 }
   0xc   :  { %22 = vsyncpa [#allocation6 + $0x1], 0 }
   0xd   :  { %23 = vsyncpa [#allocation9], 0 }
   0xe   :  { %24 = vsyncpa [#allocation12], 0 }
   0xf   :  { %25 = vsyncpa [#allocation15], 0 }
  0x10   :  { %26 = vsyncpa [#allocation4], 0 }
  0x11   :  { %28 = vsyncpa [#allocation4 + $0x1], 0  ;;  %s3084_s21 = smov 0   ;;  %s3086_s22 = smov 0  }
  0x12   :  { %s3088_s23 = smov 0   ;;  %s3090_s24 = smov 0  }
  0x13 LB: > { %s2996_s25 = smov [#allocation7]   ;;  %s3105_s27 = sadd.s32 4294967295, %s2994_s24   ;;  %s2994_s24 = sphi %s3090_s24, %s3712_s24   ;;  %s2990_s23 = sphi %s3088_s23, %s3711_s23   ;;  %s2986_s22 = sphi %s3086_s22, %s3710_s22   ;;  %s2982_s21 = sphi %s3084_s21, %s3709_s21  }
  0x14   : > { %s344_s26 = sshll.u32 %s2996_s25, 4  ;;  %p2183_p0 = scmp.ge.s32.totalorder %s2994_s24, 1  ;;  %s345_s26 = int_to_ptr.vmem [resolvable:$true] %s344_s26 }
  0x15   : > { %p3666_p1 = scmp.eq.s32.totalorder %s3105_s27, 0  ;;  %p332_p2 = scmp.lt.s32.totalorder %s2994_s24, 3 }
  0x16   : > { %s2997_s29 = smov [#allocation8]   ;;  %s2998_s14 = smov [#allocation11]  }
  0x17   : > { %p3110_p3 = pnand %p2183_p0, %p332_p2  ;;  %s358_s30 = sshll.u32 %s2997_s29, 4  ;;  %s359_s30 = int_to_ptr.vmem [resolvable:$true] %s358_s30 }
  0x18   : > { %s382_s15 = sshll.u32 %s2998_s14, 4  ;;  %s2709_s17 = scalar_lea.vmem %s345_s26, 256  ;;  %s3123_s15 = int_to_ptr.vmem [resolvable:$true] %s382_s15 }
  0x19   : > { %p2541_p5 = pneg %p3110_p3  ;;  %p2710_p8 = scmp.ne.s32.totalorder %s345_s26, %s2709_s17 }
  0x1a   : > { %p2717_p11 = scmp.lt.s32.totalorder %s345_s26, %s345_s26  ;;  %p2718_p12 = scmp.lt.s32.totalorder %s2709_s17, %s2709_s17 }
  0x1b   : > { %p3119_p6 = pnand %p2541_p5, %p3666_p1 }
  0x1c   : > { %p2719_p13 = por %p2718_p12, %p2717_p11 }
  0x1d   : > { %p3127_p7 = pneg %p3119_p6 }
  0x1f   : > { %p2712_p9 = pnand %p2710_p8, %p3127_p7 }
  0x21   : > { %p2713_p10 = pneg %p2712_p9 }
  0x23   : > { %p2720_p0 = pnand %p2719_p13, %p2713_p10 }
  0x25   : > { %2723 = shalt.err (!%p2720_p0)
}
  0x26   : > { %s3663_s18 = smov 64   ;;  %s3000_s19 = smov 4  }
  0x27   : > { %s3680_s3 = sld [smem:[#allocation26_spill]]  ;;  %s2735_s29 = scalar_lea.vmem %s359_s30, 16 }
  0x28   : > { %p2736_p2 = scmp.ne.s32.totalorder %s359_s30, %s2735_s29  ;;  %s2742_s14 = scalar_lea.vmem %s359_s30, 32 }
  0x29   : > { %p2743_p9 = scmp.lt.s32.totalorder %s359_s30, %s359_s30  ;;  %p2744_p10 = scmp.lt.s32.totalorder %s2742_s14, %s2735_s29 }
  0x2a   : > { %p2738_p5 = pnand %p2736_p2, %p3127_p7 }
  0x2b   : > { %p2745_p11 = por %p2744_p10, %p2743_p9 }
  0x2c   : > { %p2739_p8 = pneg %p2738_p5 }
  0x2d   : > { %2544 = dma.hbm_to_vmem [thread:$0]  (!%p3119_p6), %s3680_s3, 256, %s345_s26, [#allocation6], %s3663_s18, %s3663_s18, %s3000_s19  }
  0x2e   : > { %p2746_p12 = pnand %p2745_p11, %p2739_p8 }
  0x30   : > { %2749 = shalt.err (!%p2746_p12)
}
  0x31   : > { %s3681_s4 = sld [smem:[#allocation27_spill]]  ;;  %s2761_s26 = scalar_lea.vmem %s3123_s15, 16 }
  0x32   : > { %p2762_p13 = scmp.ne.s32.totalorder %s3123_s15, %s2761_s26  ;;  %s2768_s20 = scalar_lea.vmem %s3123_s15, 32 }
  0x33   : > { %p2769_p5 = scmp.lt.s32.totalorder %s3123_s15, %s3123_s15  ;;  %p2770_p8 = scmp.lt.s32.totalorder %s2768_s20, %s2761_s26 }
  0x34   : > { %p2764_p0 = pnand %p2762_p13, %p3127_p7 }
  0x35   : > { %p2771_p9 = por %p2770_p8, %p2769_p5 }
  0x36   : > { %p2765_p2 = pneg %p2764_p0 }
  0x37   : > { %2547 = dma.hbm_to_vmem [thread:$0]  (!%p3119_p6), %s3681_s4, 16, %s359_s30, [#allocation9]  }
  0x38   : > { %p2772_p10 = pnand %p2771_p9, %p2765_p2 }
  0x3a   : > { %2775 = shalt.err (!%p2772_p10)
}
  0x3b   : > { %s3682_s6 = sld [smem:[#allocation29_spill]]  ;;  %s3001_s30 = smov [#allocation10]  }
  0x3c   : > { %s368_s29 = sshll.u32 %s3001_s30, 4  ;;  %s3002_s14 = smov [#allocation13]   ;;  %s369_s29 = int_to_ptr.vmem [resolvable:$true] %s368_s29 }
  0x3d   : > { %s392_s17 = sshll.u32 %s3002_s14, 4  ;;  %s2787_s18 = scalar_lea.vmem %s369_s29, 256  ;;  %s393_s17 = int_to_ptr.vmem [resolvable:$true] %s392_s17 }
  0x3e   : > { %p2788_p11 = scmp.ne.s32.totalorder %s369_s29, %s2787_s18  ;;  %p2795_p0 = scmp.lt.s32.totalorder %s369_s29, %s369_s29 }
  0x3f   : > { %p2796_p2 = scmp.lt.s32.totalorder %s2787_s18, %s2787_s18 }
  0x40   : > { %p2790_p12 = pnand %p2788_p11, %p3127_p7 }
  0x41   : > { %2553 = dma.hbm_to_vmem [thread:$0]  (!%p3119_p6), %s3682_s6, 16, %s3123_s15, [#allocation12]  }
  0x42   : > { %p2791_p13 = pneg %p2790_p12  ;;  %p2797_p5 = por %p2796_p2, %p2795_p0 }
  0x44   : > { %p2798_p8 = pnand %p2797_p5, %p2791_p13 }
  0x46   : > { %2801 = shalt.err (!%p2798_p8)
}
  0x47   : > { %s3683_s26 = smov 64   ;;  %s3684_s5 = sld [smem:[#allocation28_spill]] }
  0x48   : > { %s2813_s12 = scalar_lea.vmem %s393_s17, 256  ;;  %p2821_p12 = scmp.lt.s32.totalorder %s393_s17, %s393_s17 }
  0x49   : > { %p2814_p9 = scmp.ne.s32.totalorder %s393_s17, %s2813_s12  ;;  %p2822_p0 = scmp.lt.s32.totalorder %s2813_s12, %s2813_s12 }
  0x4b   : > { %p2816_p10 = pnand %p2814_p9, %p3127_p7  ;;  %p2823_p13 = por %p2822_p0, %p2821_p12 }
  0x4d   : > { %2550 = dma.hbm_to_vmem [thread:$0]  (!%p3119_p6), %s3684_s5, 256, %s369_s29, [#allocation9], %s3683_s26, %s3683_s26, %s3000_s19  }
  0x4e   : > { %p2817_p11 = pneg %p2816_p10 }
  0x50   : > { %p2824_p2 = pnand %p2823_p13, %p2817_p11 }
  0x52   : > { %2827 = shalt.err (!%p2824_p2)
}
  0x53   : > { %s3685_s7 = sld [smem:[#allocation30_spill]]  ;;  %s3003_s30 = smov [#allocation14]  }
  0x54   : > { %s406_s29 = sshll.u32 %s3003_s30, 4  ;;  %s407_s29 = int_to_ptr.vmem [resolvable:$true] %s406_s29 }
  0x55   : > { %s2839_s14 = scalar_lea.vmem %s407_s29, 16  ;;  %s2846_s15 = scalar_lea.vmem %s407_s29, 32 }
  0x56   : > { %p2840_p5 = scmp.ne.s32.totalorder %s407_s29, %s2839_s14  ;;  %p2847_p10 = scmp.lt.s32.totalorder %s407_s29, %s407_s29 }
  0x57   : > { %p2848_p11 = scmp.lt.s32.totalorder %s2846_s15, %s2839_s14 }
  0x58   : > { %p2842_p8 = pnand %p2840_p5, %p3127_p7 }
  0x59   : > { %2556 = dma.hbm_to_vmem [thread:$0]  (!%p3119_p6), %s3685_s7, 256, %s393_s17, [#allocation12], %s3683_s26, %s3683_s26, %s3000_s19  }
  0x5a   : > { %p2843_p9 = pneg %p2842_p8  ;;  %p2849_p12 = por %p2848_p11, %p2847_p10 }
  0x5c   : > { %p2850_p0 = pnand %p2849_p12, %p2843_p9 }
  0x5e   : > { %2853 = shalt.err (!%p2850_p0)
}
  0x5f   : > { %s3686_s8 = sld [smem:[#allocation31_spill]]  ;;  %s2182_s16 = sadd.s32 4294967294, %s2994_s24  }
  0x60   : > { %s3190_s13 = sadd.s32 1, %s2994_s24   ;;  %s67_s17 = sadd.s32 1, %s2990_s23 }
  0x61   : > { %s64_s19 = ssub.s32 %s2994_s24, %s3190_s13  ;;  %p74_p13 = scmp.ne.s32.totalorder %s2990_s23, %s2986_s22 }
  0x62   : > { %p65_p7 = scmp.eq.s32.totalorder %s64_s19, 0  ;;  %p75_p2 = scmp.eq.s32.totalorder %s2994_s24, 0 }
  0x63   : > { %p80_p5 = scmp.ne.s32.totalorder %s2986_s22, %s2982_s21  ;;  %p319_p9 = scmp.eq.s32.totalorder %s3105_s27, 1 }
  0x64   : > { %s3201_s26 = scalar_select %p65_p7, %s2990_s23, %s67_s17  }
  0x65   : > { %2559 = dma.hbm_to_vmem [thread:$0]  (!%p3119_p6), %s3686_s8, 16, %s407_s29, [#allocation15]  }
  0x66   : > { %3687 = sst [smem:[#allocation24_spill]] %s3201_s26  ;;  %p3203_p8 = por %p75_p2, %p74_p13 }
  0x67   : > { %p3209_p6 = por %p3666_p1, %p80_p5  ;;  %p325_p10 = scmp.eq.s32.totalorder %s2182_s16, 1 }
  0x68   : > { %p2577_p11 = scmp.lt.s32.totalorder %s2994_s24, 2  ;;  %s435_s30 = sand.u32 1, %s2990_s23  }
  0x69   : > { %s3689_s25 = scalar_select %p3209_p6, 1, 0 }
  0x6a   : > { %p3216_p12 = por %p319_p9, %p74_p13  ;;  %p3220_p0 = por %p325_p10, %p80_p5 }
  0x6b   : > { %s3224_s15 = sshll.u32 %s435_s30, 4  ;;  %s3665_s20 = sshll.u32 %s2994_s24, 8 }
  0x6c   : > { %s3690_s29 = scalar_select %p3216_p12, 1, 0 }
  0x6d   : > { %s3691_s14 = scalar_select %p3220_p0, 1, 0 }
  0x6e   : > { %s3692_s1 = sld [smem:[#allocation25_spill]]  ;;  %s439_s16 = scalar_lea.vmem [#allocation2], %s3224_s15 }
  0x6f   : > { %s446_s3 = sshll.u32 %s439_s16, 4  ;;  %p3239_p7 = pnand %p2577_p11, %p3203_p8  ;;  %s3235_s3 = int_to_ptr.vmem [resolvable:$true] %s446_s3 }
  0x70   : > { %s3243_s5 = scalar_lea.sflag [#allocation3], %s435_s30 }
  0x71   : > { %p2856_p2 = pneg %p3239_p7 }
  0x74   : > { %s3232_s17 = scalar_lea.hbm %s3692_s1, %s3665_s20  ;;  %s2859_s18 = scalar_lea.hbm %s3692_s1, 512 }
  0x75   : > { %s2854_s6 = scalar_lea.hbm %s3232_s17, 256  ;;  %p2860_p8 = scmp.lt.s32.totalorder %s3232_s17, %s3692_s1 }
  0x76   : > { %p2855_p13 = scmp.ne.s32.totalorder %s3232_s17, %s2854_s6  ;;  %p2861_p10 = scmp.lt.s32.totalorder %s2859_s18, %s2854_s6 }
  0x78   : > { %p2857_p5 = pnand %p2856_p2, %p2855_p13  ;;  %p2862_p11 = por %p2861_p10, %p2860_p8 }
  0x7a   : > { %p2858_p9 = pneg %p2857_p5 }
  0x7c   : > { %p2863_p4 = pnand %p2862_p11, %p2858_p9 }
  0x7e   : > { %2866 = shalt.err (!%p2863_p4)
}
  0x7f   : > { %s2867_s30 = scalar_lea.vmem %s3235_s3, 256  ;;  %s3004_s12 = smov [#allocation2]  }
  0x80   : > { %p2868_p1 = scmp.ne.s32.totalorder %s3235_s3, %s2867_s30  ;;  %s2872_s19 = sshll.u32 %s3004_s12, 4  ;;  %s2873_s19 = int_to_ptr.vmem [resolvable:$false] %s2872_s19 }
  0x81   : > { %s2874_s7 = scalar_lea.vmem %s2873_s19, 512  ;;  %p2875_p0 = scmp.lt.s32.totalorder %s3235_s3, %s2873_s19 }
  0x82   : > { %p2870_p13 = pnand %p2868_p1, %p2856_p2  ;;  %p2876_p12 = scmp.lt.s32.totalorder %s2874_s7, %s2867_s30 }
  0x84   : > { %p2871_p5 = pneg %p2870_p13  ;;  %p2877_p6 = por %p2876_p12, %p2875_p0 }
  0x86   : > { %p2878_p8 = pnand %p2877_p6, %p2871_p5 }
  0x88   : > { %2881 = shalt.err (!%p2878_p8)
}
  0x89   : > { %s3005_s6 = smov 128   ;;  %s3006_s20 = smov 8  }
  0x8a   : > { %2563 = dma.hbm_to_vmem [thread:$0]  (!%p3239_p7), %s3232_s17, 256, %s3235_s3, %s3243_s5, %s3005_s6, %s3005_s6, %s3006_s20  }
  0x8b   : > { %s3694_s18 = sshll.u32 %s2994_s24, 8  ;;  %s460_s12 = scalar_lea.vmem [#allocation5], %s3224_s15 }
  0x8c   : > { %s3278_s30 = scalar_lea.hbm %s3651_s2, %s3694_s18  ;;  %s467_s19 = sshll.u32 %s460_s12, 4  ;;  %s3281_s19 = int_to_ptr.vmem [resolvable:$true] %s467_s19 }
  0x8d   : > { %s456_s1 = sand.u32 1, %s2994_s24   ;;  %s2882_s26 = scalar_lea.hbm %s3278_s30, 256 }
  0x8e   : > { %s457_s8 = scalar_lea.sflag [#allocation6], %s456_s1  ;;  %p2883_p1 = scmp.ne.s32.totalorder %s3278_s30, %s2882_s26 }
  0x8f   : > { %s2887_s17 = scalar_lea.hbm %s3651_s2, 512  ;;  %p2888_p12 = scmp.lt.s32.totalorder %s3278_s30, %s3651_s2 }
  0x90   : > { %p2885_p4 = pnand %p2883_p1, %p2856_p2  ;;  %p2889_p0 = scmp.lt.s32.totalorder %s2887_s17, %s2882_s26 }
  0x92   : > { %p2886_p6 = pneg %p2885_p4  ;;  %p2890_p9 = por %p2889_p0, %p2888_p12 }
  0x94   : > { %p2891_p10 = pnand %p2890_p9, %p2886_p6 }
  0x96   : > { %2894 = shalt.err (!%p2891_p10)
}
  0x97   : > { %s2895_s1 = scalar_lea.vmem %s3281_s19, 256  ;;  %s3007_s15 = smov [#allocation5]  }
  0x98   : > { %p2896_p11 = scmp.ne.s32.totalorder %s3281_s19, %s2895_s1  ;;  %s2900_s16 = sshll.u32 %s3007_s15, 4  ;;  %s2901_s16 = int_to_ptr.vmem [resolvable:$false] %s2900_s16 }
  0x99   : > { %s2902_s12 = scalar_lea.vmem %s2901_s16, 512  ;;  %p2903_p8 = scmp.lt.s32.totalorder %s3281_s19, %s2901_s16 }
  0x9a   : > { %p2898_p13 = pnand %p2896_p11, %p2856_p2  ;;  %p2904_p1 = scmp.lt.s32.totalorder %s2902_s12, %s2895_s1 }
  0x9c   : > { %p2899_p5 = pneg %p2898_p13  ;;  %p2905_p4 = por %p2904_p1, %p2903_p8 }
  0x9e   : > { %p2906_p12 = pnand %p2905_p4, %p2899_p5 }
  0xa0   : > { %2909 = shalt.err (!%p2906_p12)
}
  0xa1   : > { %2566 = dma.hbm_to_vmem [thread:$0]  (!%p3239_p7), %s3278_s30, 256, %s3281_s19, %s457_s8, %s3005_s6, %s3005_s6, %s3006_s20  }
  0xa2   : > { %479 = sbr.rel (%p3110_p3) target bundleno = 1855 (0x73f), region = 68  ;;  %s3312_s26 = sand.u32 (!%p3110_p3), 1, %s2986_s22  }
  0xa3   : > { %s3315_s3 = sshll.u32 (!%p3110_p3), %s3312_s26, 4  ;;  %s482_s5 = scalar_lea.sflag (!%p3110_p3), [#allocation3], %s3312_s26 }
  0xa4   : > { %s485_s4 = scalar_lea.vmem (!%p3110_p3), [#allocation2], %s3315_s3  ;;  %p3695_p2 = scmp.ne.s32.totalorder (!%p3110_p3), %s3689_s25, 0 }
  0xa7   : > { %2953 = dma.done.wait (%p3695_p2), %s482_s5, 256  }
  0xa8   : > { %2955 = vsyncadd (%p3695_p2), %s482_s5, 4294967040  ;;  %s490_s8 = sand.u32 1, %s3105_s27   ;;  %s494_s6 = scalar_lea.vmem [#allocation5], %s3315_s3 }
  0xa9   : > { %s491_s28 = scalar_lea.sflag [#allocation6], %s490_s8 }
  0xaa   : > { %2957 = dma.done.wait (%p3695_p2), %s491_s28, 256  }
  0xab   : > { %2959 = vsyncadd (%p3695_p2), %s491_s28, 4294967040  ;;  %p3696_p3 = scmp.eq.s32.totalorder %s3105_s27, 0 }
  0xad   : > { %2961 = dma.done.wait (%p3696_p3), [#allocation6], 256   ;;  %p3697_p7 = pmov %p3696_p3 }
  0xae   : > { %p3698_p6 = pmov %p3696_p3 }
  0xaf   : > { %2963 = vsyncadd (%p3697_p7), [#allocation6], 4294967040 }
  0xb0   : > { %2965 = dma.done.wait (%p3698_p6), [#allocation9], 272   ;;  %p3699_p0 = pmov %p3696_p3 }
  0xb2   : > { %2967 = vsyncadd (%p3699_p0), [#allocation9], 4294967024  ;;  %p3700_p9 = pmov %p3699_p0 }
  0xb3   : > { %p3701_p10 = pmov %p3699_p0 }
  0xb4   : > { %2969 = dma.done.wait (%p3700_p9), [#allocation12], 272  }
  0xb5   : > { %2971 = vsyncadd (%p3701_p10), [#allocation12], 4294967024  ;;  %p3702_p11 = pmov %p3699_p0 }
  0xb6   : > { %p3703_p13 = pmov %p3699_p0 }
  0xb7   : > { %2973 = dma.done.wait (%p3702_p11), [#allocation15], 16  }
  0xb8   : > { %2975 = vsyncadd (%p3703_p13), [#allocation15], 4294967280  ;;  %s2207_s25 = sshll.u32 %s3105_s27, 1  ;;  %v3008_v0 = vmov 0.0   ;;  %vm3009_vm0 = vmmov 0   ;;  %v2652_v1 = vld [vmem:[#allocation10 + $0x8] sm:$0xff]  }
  0xb9   : > { %2339 = vmatprep.subr.bf16.mxu1 %v3008_v0  ;;  %2331 = vmatprep.subr.bf16.mxu0 %v3008_v0  ;;  %p570_p5 = scmp.lt.s32.totalorder %s2207_s25, 3  ;;  %v2653_v2 = vld [vmem:[#allocation7 + $0x8] sm:$0xff]   ;;  %v2654_v3 = vld [vmem:[#allocation10] sm:$0xff]   ;;  %v2655_v4 = vld [vmem:[#allocation7] sm:$0xff]   ;;  %vm611_vm1 = vcmask 261120   ;;  %vm793_vm2 = vcmask 130048  }
  0xba   : > { %2343 = vmatprep.mubr.msk.bf16.mxu1 %vm3009_vm0, %v3008_v0  ;;  %2335 = vmatprep.mubr.msk.bf16.mxu0 %vm3009_vm0, %v3008_v0  ;;  %v582_v5 = vld [vmem:[%s485_s4] sm:$0xff]  ;;  %v583_v6 = vld [vmem:[%s485_s4 + $0x8] sm:$0xff]  ;;  %s3010_s18 = smov 96   ;;  %s3011_s7 = smov 112   ;;  %vm1286_vm3 = vcmask 1043456   ;;  %vm1190_vm4 = vcmask 64512  }
  0xbb   : > { %s3714_s25 = smov (!%p570_p5, %s2207_s25), 3  ;;  %2340 = vmatpush3.bf16.msra.mxu1 %v2652_v1  ;;  %2332 = vmatpush3.bf16.msra.mxu0 %v2653_v2  ;;  %v584_v8 = vpack.c.bf16 %v583_v6, %v582_v5  ;;  %v2656_v11 = vld [vmem:[#allocation13 + $0x8] sm:$0xff]   ;;  %v2657_v12 = vld [vmem:[#allocation13] sm:$0xff]   ;;  %v2213_v18 = vld [vmem:[#allocation11] ss:$0 sm:$0xff]  ;;  %s3012_s1 = smov 80  }
  0xbc   : > { %s2208_s20 = sshll.u32 %s3714_s25, 3  ;;  %2341 = vmatprep.subr.bf16.mxu1 %v3008_v0  ;;  %2333 = vmatprep.subr.bf16.mxu0 %v3008_v0  ;;  %v585_v13 = vld [vmem:[%s494_s6] sm:$0xff]  ;;  %v586_v14 = vld [vmem:[%s494_s6 + $0x8] sm:$0xff]  ;;  %vm1685_vm5 = vcmask 523264   ;;  %s3014_s16 = smov 32   ;;  %vm1914_vm6 = vcmask 392192  }
  0xbd   : > { %s573_s17 = scalar_lea.vmem %s3649_s0, %s2208_s20  ;;  %v587_v15 = vpack.c.bf16 %v586_v14, %v585_v13  ;;  %v2209_v19 = vld [vmem:[#allocation8] ss:$0 sm:$0xff]  ;;  %v2217_v50 = vld [vmem:[#allocation14] ss:$0 sm:$0xff]  ;;  %s3015_s12 = smov 48  }
  0xbe   : > { %v579_v7 = vld [vmem:[%s573_s17] sm:$0xff]  ;;  %v580_v9 = vld [vmem:[%s573_s17 + $0x8] sm:$0xff]  ;;  %s568_s8 = scalar_lea.vmem [#allocation16], %s3315_s3  ;;  %s2264_s6 = sshll.u32 %s3105_s27, 8 }
  0xbf   : > { %2342 = vmatpush3.bf16.msra.mxu1 %v2654_v3  ;;  %v581_v10 = vpack.c.bf16 %v580_v9, %v579_v7  ;;  %2334 = vmatpush3.bf16.msra.mxu0 %v2655_v4  ;;  %s2017_s28 = sshll.u32 %s568_s8, 4  ;;  %s3704_s30 = sld [smem:[#allocation32_spill]]  ;;  %s3600_s28 = int_to_ptr.vmem [resolvable:$true] %s2017_s28 }
  0xc0   : > { %2355 = vmatprep.subr.bf16.mxu1 %v3008_v0  ;;  %2347 = vmatprep.subr.bf16.mxu0 %v3008_v0  ;;  %s2004_s3 = scalar_lea.sflag [#allocation4], %s3312_s26  ;;  %s2910_s27 = scalar_lea.vmem %s3600_s28, 256 }
  0xc1   : > { %p2911_p8 = scmp.ne.s32.totalorder %s3600_s28, %s2910_s27  ;;  %p3705_p1 = scmp.ne.s32.totalorder %s3690_s29, 0 }
  0xc2   : > { %2344 = vmatmul.mubr.msk.bf16.vlgmr.msra.gmra.mxu1 %vm611_vm1, %v584_v8  ;;  %2336 = vmatmul.mubr.msk.bf16.vlgmr.msra.gmra.mxu0 %vm611_vm1, %v581_v10  ;;  %s3016_s17 = smov [#allocation16]  }
  0xc3   : > { %2357 = vmatprep.mubr.msk.bf16.mxu1 %vm3009_vm0, %v3008_v0  ;;  %2351 = vmatprep.mubr.msk.bf16.mxu0 %vm3009_vm0, %v3008_v0  ;;  %p2912_p4 = pnand %p2911_p8, %p3705_p1 }
  0xc4   : > { %2348 = vmatpush3.bf16.msra.mxu0 %v2656_v11 }
  0xc5   : > { %2349 = vmatprep.subr.bf16.mxu0 %v3008_v0  ;;  %s3605_s19 = scalar_lea.hbm %s3704_s30, %s2264_s6  ;;  %p2913_p12 = pneg %p2912_p4 }
  0xc8   : > { %2350 = vmatpush3.bf16.msra.mxu0 %v2657_v12 }
  0xc9   : > { %2361 = vmatprep.subr.bf16.mxu0 %v3008_v0 }
  0xcb   : > { %2352 = vmatmul.mubr.msk.bf16.vlgmr.msra.gmra.mxu0 %vm611_vm1, %v587_v15 }
  0xcc   : > { %2363 = vmatprep.mubr.msk.bf16.mxu0 %vm3009_vm0, %v3008_v0 }
 0x182   : > { %v716_v16 = vpop.f32.mrf.mxu1  ;;  %v649_v17 = vpop.f32.mrf.mxu0 }
 0x183   : > { %v717_v23 = vadd.f32 %v2213_v18, %v716_v16  ;;  %v650_v24 = vadd.f32 %v2209_v19, %v649_v17 }
 0x184   : > { %v2345_v20 = vpop.f32.mrf.mxu1  ;;  %v2337_v21 = vpop.f32.mrf.mxu0 }
 0x186   : > { %v719_v22 = vpop.f32.mrf.mxu1  ;;  %v652_v26 = vpop.f32.mrf.mxu0 }
 0x187   : > { %v720_v25 = vadd.f32 %v2213_v18, %v719_v22  ;;  %v653_v27 = vadd.f32 %v2209_v19, %v652_v26 }
 0x188   : > { %v2346_v28 = vpop.f32.mrf.mxu1  ;;  %v2338_v30 = vpop.f32.mrf.mxu0 }
 0x189   : > { %v791_v29 = vpack.c.bf16 %v720_v25, %v717_v23  ;;  %v790_v31 = vpack.c.bf16 %v653_v27, %v650_v24 }
 0x18b   : > { %894 = vrot.lane.b32.xlu1 %v791_v29, %s3010_s18  ;;  %844 = vrot.lane.b32.xlu0 %v791_v29, %s3011_s7  ;;  %v798_v32 = vsel %vm793_vm2, %v791_v29, 0  ;;  %v993_v33 = vrot.slane %v791_v29, 4  ;;  %v992_v34 = vrot.slane %v790_v31, 4  ;;  %v783_v35 = vpop.f32.mrf.mxu0 }
 0x18c   : > { %2356 = vmatpush3.bf16.xpose.msra.mxu1 %v798_v32  ;;  %v784_v53 = vadd.f32 %v2217_v50, %v783_v35 }
 0x18d   : > { %2367 = vmatprep.subr.bf16.mxu1 %v3008_v0  ;;  %v2353_v36 = vpop.f32.mrf.mxu0  ;;  %v998_v47 = vsel %vm793_vm2, %v993_v33, 0 }
 0x18f   : > { %944 = vrot.lane.b32.xlu1 %v791_v29, %s3012_s1  ;;  %841 = vrot.lane.b32.xlu0 %v790_v31, %s3011_s7  ;;  %v786_v37 = vpop.f32.mrf.mxu0 }
 0x190   : > { %v787_v54 = vadd.f32 %v2217_v50, %v786_v37 }
 0x191   : > { %v2354_v38 = vpop.f32.mrf.mxu0 }
 0x192   : > { %v3418_v57 = vpack.c.bf16 %v787_v54, %v784_v53 }
 0x193   : > { %942 = vrot.lane.b32.xlu1 %v790_v31, %s3012_s1  ;;  %892 = vrot.lane.b32.xlu0 %v790_v31, %s3010_s18 }
 0x194   : > { %2358 = vmatmul.mubr.msk.bf16.vlgmr.msra.gmra.mxu1 %vm793_vm2, %v790_v31  ;;  %v1288_v60 = vsel %vm1286_vm3, %v3418_v57, 0 }
 0x195   : > { %2369 = vmatprep.mubr.msk.bf16.mxu1 %vm3009_vm0, %v3008_v0 }
 0x197   : > { %1042 = vrot.lane.b32.xlu0 %v993_v33, %s3011_s7  ;;  %1040 = vrot.lane.b32.xlu1 %v992_v34, %s3011_s7 }
 0x19b   : > { %1092 = vrot.lane.b32.xlu0 %v993_v33, %s3010_s18  ;;  %1142 = vrot.lane.b32.xlu1 %v993_v33, %s3012_s1 }
 0x19f   : > { %1090 = vrot.lane.b32.xlu0 %v992_v34, %s3010_s18  ;;  %1140 = vrot.lane.b32.xlu1 %v992_v34, %s3012_s1 }
 0x1fd   : > { %v895_v39 = vpop.permute.xlu1 %894  ;;  %v845_v40 = vpop.permute.xlu0 %844 }
 0x1fe   : > { %v900_v41 = vsel %vm793_vm2, %v895_v39, 0  ;;  %v850_v42 = vsel %vm793_vm2, %v845_v40, 0 }
 0x1ff   : > { %2362 = vmatpush3.bf16.xpose.msra.mxu0 %v850_v42  ;;  %2368 = vmatpush3.bf16.xpose.msra.mxu1 %v900_v41 }
 0x200   : > { %2373 = vmatprep.subr.bf16.mxu0 %v3008_v0  ;;  %2379 = vmatprep.subr.bf16.mxu1 %v3008_v0 }
 0x201   : > { %v945_v43 = vpop.permute.xlu1 %944  ;;  %v842_v44 = vpop.permute.xlu0 %841 }
 0x202   : > { %v950_v46 = vsel %vm793_vm2, %v945_v43, 0 }
 0x205   : > { %v893_v45 = vpop.permute.xlu0 %892  ;;  %v943_v48 = vpop.permute.xlu1 %942 }
 0x206   : > { %2364 = vmatmul.mubr.msk.bf16.vlgmr.msra.gmra.mxu0 %vm793_vm2, %v842_v44  ;;  %2370 = vmatmul.mubr.msk.bf16.vlgmr.msra.gmra.mxu1 %vm793_vm2, %v893_v45 }
 0x207   : > { %2374 = vmatpush3.bf16.xpose.msra.mxu0 %v950_v46  ;;  %2380 = vmatpush3.bf16.xpose.msra.mxu1 %v998_v47 }
 0x208   : > { %2375 = vmatprep.mubr.msk.bf16.mxu0 %vm3009_vm0, %v3008_v0  ;;  %2381 = vmatprep.mubr.msk.bf16.mxu1 %vm3009_vm0, %v3008_v0 }
 0x209   : > { %v1043_v49 = vpop.permute.xlu0 %1042  ;;  %2385 = vmatprep.subr.bf16.mxu0 %v3008_v0  ;;  %2391 = vmatprep.subr.bf16.mxu1 %v3008_v0  ;;  %v1041_v51 = vpop.permute.xlu1 %1040 }
 0x20a   : > { %v1048_v55 = vsel %vm793_vm2, %v1043_v49, 0 }
 0x20d   : > { %v1093_v52 = vpop.permute.xlu0 %1092  ;;  %v1143_v58 = vpop.permute.xlu1 %1142 }
 0x20e   : > { %v1098_v56 = vsel %vm793_vm2, %v1093_v52, 0  ;;  %2376 = vmatmul.mubr.msk.bf16.vlgmr.msra.gmra.mxu0 %vm793_vm2, %v943_v48  ;;  %2382 = vmatmul.mubr.msk.bf16.vlgmr.msra.gmra.mxu1 %vm793_vm2, %v992_v34  ;;  %v1148_v61 = vsel %vm793_vm2, %v1143_v58, 0 }
 0x20f   : > { %2386 = vmatpush3.bf16.xpose.msra.mxu0 %v1048_v55  ;;  %2392 = vmatpush3.bf16.xpose.msra.mxu1 %v1098_v56 }
 0x210   : > { %2387 = vmatprep.mubr.msk.bf16.mxu0 %vm3009_vm0, %v3008_v0  ;;  %2393 = vmatprep.mubr.msk.bf16.mxu1 %vm3009_vm0, %v3008_v0 }
 0x211   : > { %2397 = vmatprep.subr.bf16.mxu0 %v3008_v0  ;;  %2403 = vmatprep.subr.bf16.mxu1 %v3008_v0  ;;  %v1091_v59 = vpop.permute.xlu0 %1090  ;;  %v1141_v62 = vpop.permute.xlu1 %1140 }
 0x216   : > { %2388 = vmatmul.mubr.msk.bf16.vlgmr.msra.gmra.mxu0 %vm793_vm2, %v1041_v51  ;;  %2394 = vmatmul.mubr.msk.bf16.vlgmr.msra.gmra.mxu1 %vm793_vm2, %v1091_v59 }
 0x217   : > { %2398 = vmatpush3.bf16.xpose.msra.mxu0 %v1148_v61  ;;  %2399 = vmatprep.mubr.msk.bf16.mxu0 %vm3009_vm0, %v3008_v0 }
 0x218   : > { %2404 = vmatpush3.bf16.msra.mxu1 %v1288_v60  ;;  %2409 = vmatprep.subr.bf16.mxu0 %v3008_v0 }
 0x219   : > { %2405 = vmatprep.mubr.msk.bf16.mxu1 %vm3009_vm0, %v3008_v0  ;;  %2415 = vmatprep.subr.bf16.mxu1 %v3008_v0 }
 0x21e   : > { %2400 = vmatmul.mubr.msk.bf16.vlgmr.msra.gmra.mxu0 %vm793_vm2, %v1141_v62 }
 0x21f   : > { %2411 = vmatprep.mubr.msk.bf16.mxu0 %vm3009_vm0, %v3008_v0 }
 0x254   : > { %v834_v63 = vpop.f32.mrf.mxu1 }
 0x255   : > { %v1191_v1 = vsel %vm1190_vm4, %v834_v63, -inf }
 0x256   : > { %1192 = vmax.xlane.f32.xlu0 %v1191_v1  ;;  %v2359_v2 = vpop.f32.mrf.mxu1 }
 0x258   : > { %v837_v3 = vpop.f32.mrf.mxu1 }
 0x25a   : > { %v2360_v4 = vpop.f32.mrf.mxu1 }
 0x2c6   : > { %v886_v5 = vpop.f32.mrf.mxu0  ;;  %v936_v6 = vpop.f32.mrf.mxu1 }
 0x2c7   : > { %v1197_v7 = vsel %vm1190_vm4, %v936_v6, -inf  ;;  %v1194_v8 = vsel %vm1190_vm4, %v886_v5, -inf }
 0x2c8   : > { %1198 = vmax.xlane.f32.xlu0 %v1197_v7  ;;  %v2371_v9 = vpop.f32.mrf.mxu1  ;;  %1195 = vmax.xlane.f32.xlu1 %v1194_v8  ;;  %v2365_v10 = vpop.f32.mrf.mxu0 }
 0x2ca   : > { %v889_v11 = vpop.f32.mrf.mxu0  ;;  %v939_v12 = vpop.f32.mrf.mxu1 }
 0x2cb   : > { %v1479_v11 = vrot.slane %v3418_v57, 4 }
 0x2cc   : > { %v2366_v13 = vpop.f32.mrf.mxu0  ;;  %v2372_v14 = vpop.f32.mrf.mxu1 }
 0x2ce   : > { %v986_v15 = vpop.f32.mrf.mxu0  ;;  %v1034_v16 = vpop.f32.mrf.mxu1 }
 0x2cf   : > { %v1203_v17 = vsel %vm1190_vm4, %v1034_v16, -inf  ;;  %v1200_v18 = vsel %vm1190_vm4, %v986_v15, -inf }
 0x2d0   : > { %v2383_v19 = vpop.f32.mrf.mxu1  ;;  %1204 = vmax.xlane.f32.xlu1 %v1203_v17  ;;  %1201 = vmax.xlane.f32.xlu0 %v1200_v18  ;;  %v2377_v20 = vpop.f32.mrf.mxu0 }
 0x2d2   : > { %v989_v21 = vpop.f32.mrf.mxu0  ;;  %v1037_v22 = vpop.f32.mrf.mxu1 }
 0x2d4   : > { %v2378_v23 = vpop.f32.mrf.mxu0  ;;  %v2384_v24 = vpop.f32.mrf.mxu1 }
 0x2d6   : > { %v1084_v25 = vpop.f32.mrf.mxu0  ;;  %v3440_v26 = vpop.f32.mrf.mxu1 }
 0x2d7   : > { %v1209_v27 = vsel %vm1190_vm4, %v3440_v26, -inf  ;;  %v1206_v28 = vsel %vm1190_vm4, %v1084_v25, -inf }
 0x2d8   : > { %v2395_v29 = vpop.f32.mrf.mxu1  ;;  %1210 = vmax.xlane.f32.xlu1 %v1209_v27  ;;  %1207 = vmax.xlane.f32.xlu0 %v1206_v28  ;;  %v2389_v30 = vpop.f32.mrf.mxu0 }
 0x2da   : > { %v1087_v31 = vpop.f32.mrf.mxu0  ;;  %v1137_v32 = vpop.f32.mrf.mxu1 }
 0x2dc   : > { %v2390_v33 = vpop.f32.mrf.mxu0  ;;  %v2396_v34 = vpop.f32.mrf.mxu1 }
 0x2de   : > { %v3445_v35 = vpop.f32.mrf.mxu0 }
 0x2df   : > { %v1212_v36 = vsel %vm1190_vm4, %v3445_v35, -inf  ;;  %v1193_v40 = vpop.xlane.xlu0 %1192 }
 0x2e0   : > { %1213 = vmax.xlane.f32.xlu0 %v1212_v36  ;;  %v2401_v37 = vpop.f32.mrf.mxu0  ;;  %v1215_v41 = vsub.f32 %v834_v63, %v1193_v40 }
 0x2e2   : > { %v1187_v38 = vpop.f32.mrf.mxu0  ;;  %v1223_v42 = vmul.f32 1.442695, %v1215_v41 }
 0x2e4   : > { %v2402_v39 = vpop.f32.mrf.mxu0  ;;  %2666 = vpow2.f32 %v1223_v42  ;;  %v1484_v42 = vsel %vm1286_vm3, %v1479_v11, 0 }
 0x2e9   : > { %1333 = vrot.lane.b32.xlu1 %v3418_v57, %s3011_s7 }
 0x2f1   : > { %v3451_v43 = vpop.eup %2666 }
 0x2f2   : > { %v1239_v44 = vsel %vm1190_vm4, %v3451_v43, 0.0 }
 0x30d   : > { %1240 = vadd.xlane.f32.xlu1 %v1239_v44 }
 0x351   : > { %v1199_v45 = vpop.xlane.xlu0 %1198  ;;  %v1196_v46 = vpop.xlane.xlu1 %1195 }
 0x352   : > { %v1217_v47 = vsub.f32 %v936_v6, %v1199_v45  ;;  %v1216_v48 = vsub.f32 %v886_v5, %v1196_v46 }
 0x354   : > { %v1227_v49 = vmul.f32 1.442695, %v1217_v47  ;;  %v1225_v50 = vmul.f32 1.442695, %v1216_v48 }
 0x356   : > { %2668 = vpow2.f32 %v1227_v49 }
 0x357   : > { %2670 = vpow2.f32 %v1225_v50 }
 0x359   : > { %v1205_v51 = vpop.xlane.xlu1 %1204  ;;  %v1202_v52 = vpop.xlane.xlu0 %1201 }
 0x35a   : > { %v1219_v53 = vsub.f32 %v1034_v16, %v1205_v51  ;;  %v1218_v54 = vsub.f32 %v986_v15, %v1202_v52 }
 0x35c   : > { %v1231_v55 = vmul.f32 1.442695, %v1219_v53  ;;  %v1229_v56 = vmul.f32 1.442695, %v1218_v54 }
 0x35e   : > { %2672 = vpow2.f32 %v1231_v55 }
 0x35f   : > { %2674 = vpow2.f32 %v1229_v56 }
 0x361   : > { %v1211_v58 = vpop.xlane.xlu1 %1210  ;;  %v1208_v59 = vpop.xlane.xlu0 %1207 }
 0x362   : > { %v1220_v60 = vsub.f32 %v1084_v25, %v1208_v59  ;;  %v1221_v12 = vsub.f32 %v3440_v26, %v1211_v58 }
 0x363   : > { %v3455_v61 = vpop.eup %2668 }
 0x364   : > { %v2671_v62 = vpop.eup %2670  ;;  %v1233_v63 = vmul.f32 1.442695, %v1220_v60  ;;  %v1245_v1 = vsel %vm1190_vm4, %v3455_v61, 0.0  ;;  %v1235_v14 = vmul.f32 1.442695, %v1221_v12 }
 0x365   : > { %1246 = vadd.xlane.f32.xlu1 %v1245_v1  ;;  %v1334_v2 = vpop.permute.xlu1 %1333  ;;  %v1242_v3 = vsel %vm1190_vm4, %v2671_v62, 0.0 }
 0x366   : > { %v1339_v4 = vsel %vm1286_vm3, %v1334_v2, 0  ;;  %1243 = vadd.xlane.f32.xlu0 %v1242_v3  ;;  %2676 = vpow2.f32 %v1233_v63 }
 0x367   : > { %2410 = vmatpush3.bf16.msra.mxu0 %v1339_v4  ;;  %2678 = vpow2.f32 %v1235_v14 }
 0x368   : > { %2421 = vmatprep.subr.bf16.mxu0 %v3008_v0 }
 0x369   : > { %v1214_v13 = vpop.xlane.xlu0 %1213 }
 0x36a   : > { %v1222_v15 = vsub.f32 %v3445_v35, %v1214_v13 }
 0x36b   : > { %v3462_v5 = vpop.eup %2672 }
 0x36c   : > { %v2675_v6 = vpop.eup %2674  ;;  %v1251_v7 = vsel %vm1190_vm4, %v3462_v5, 0.0  ;;  %v1237_v16 = vmul.f32 1.442695, %v1222_v15 }
 0x36d   : > { %1252 = vadd.xlane.f32.xlu1 %v1251_v7  ;;  %v1248_v8 = vsel %vm1190_vm4, %v2675_v6, 0.0 }
 0x36e   : > { %1249 = vadd.xlane.f32.xlu0 %v1248_v8  ;;  %2680 = vpow2.f32 %v1237_v16 }
 0x373   : > { %v3467_v9 = vpop.eup %2676 }
 0x374   : > { %v1254_v10 = vsel %vm1190_vm4, %v3467_v9, 0.0  ;;  %v3479_v17 = vpop.eup %2678 }
 0x375   : > { %1255 = vadd.xlane.f32.xlu0 %v1254_v10  ;;  %v1257_v18 = vsel %vm1190_vm4, %v3479_v17, 0.0 }
 0x37b   : > { %v3483_v19 = vpop.eup %2680 }
 0x37e   : > { %1431 = vrot.lane.b32.xlu1 %v3418_v57, %s3012_s1 }
 0x382   : > { %1528 = vrot.lane.b32.xlu1 %v1479_v11, %s3011_s7  ;;  %s3013_s7 = smov 16  }
 0x38b   : > { %1381 = vrot.lane.b32.xlu0 %v3418_v57, %s3010_s18  ;;  %v1260_v57 = vsel %vm1190_vm4, %v3483_v19, 0.0 }
 0x396   : > { %v1241_v20 = vpop.xlane.xlu1 %1240 }
 0x397   : > { %2682 = vrcp.f32 %v1241_v20 }
 0x3a4   : > { %v2683_v24 = vpop.eup %2682 }
 0x3a5   : > { %v1271_v27 = vmul.f32 %v2683_v24, %v3451_v43 }
 0x3a6   : > { %1258 = vadd.xlane.f32.xlu1 %v1257_v18 }
 0x3aa   : > { %1261 = vadd.xlane.f32.xlu0 %v1260_v57 }
 0x3b7   : > { %1626 = vrot.lane.b32.xlu1 %v1479_v11, %s3012_s1 }
 0x3c0   : > { %1576 = vrot.lane.b32.xlu0 %v1479_v11, %s3010_s18  ;;  %s2914_s18 = sshll.u32 %s3016_s17, 4  ;;  %s2915_s18 = int_to_ptr.vmem [resolvable:$false] %s2914_s18 }
 0x3c1   : > { %p2917_p2 = scmp.lt.s32.totalorder %s3600_s28, %s2915_s18 }
 0x3ee   : > { %v1247_v22 = vpop.xlane.xlu1 %1246 }
 0x3ef   : > { %v1244_v21 = vpop.xlane.xlu0 %1243 }
 0x3f0   : > { %2684 = vrcp.f32 %v1244_v21 }
 0x3f1   : > { %2686 = vrcp.f32 %v1247_v22 }
 0x3f6   : > { %v1253_v25 = vpop.xlane.xlu1 %1252 }
 0x3f7   : > { %v1250_v23 = vpop.xlane.xlu0 %1249 }
 0x3f8   : > { %2688 = vrcp.f32 %v1250_v23 }
 0x3f9   : > { %2690 = vrcp.f32 %v1253_v25 }
 0x3fa   : > { %v1432_v31 = vpop.permute.xlu1 %1431 }
 0x3fb   : > { %v1437_v35 = vsel %vm1286_vm3, %v1432_v31, 0 }
 0x3fd   : > { %v2685_v26 = vpop.eup %2684 }
 0x3fe   : > { %v1272_v28 = vmul.f32 %v2685_v26, %v2671_v62  ;;  %v1256_v29 = vpop.xlane.xlu0 %1255  ;;  %v2687_v33 = vpop.eup %2686 }
 0x3ff   : > { %2692 = vrcp.f32 %v1256_v29  ;;  %v1273_v38 = vmul.f32 %v2687_v33, %v3455_v61  ;;  %v1529_v41 = vpop.permute.xlu1 %1528 }
 0x400   : > { %v1279_v30 = vpack.c.bf16 %v1272_v28, %v1271_v27  ;;  %v1534_v45 = vsel %vm1286_vm3, %v1529_v41, 0  ;;  %v2663_v41 = vld [vmem:[%s3658_s9 + $0x10] sm:$0xff]  }
 0x402   : > { %2406 = vmatmul.mubr.msk.bf16.vlgmr.msra.gmra.mxu1 %vm1190_vm4, %v1279_v30  ;;  %v1331_v32 = vrot.slane %v1279_v30, 4  ;;  %v1382_v34 = vpop.permute.xlu0 %1381 }
 0x403   : > { %2417 = vmatprep.mubr.msk.bf16.mxu1 %vm3009_vm0, %v3008_v0  ;;  %v1387_v36 = vsel %vm1286_vm3, %v1382_v34, 0 }
 0x404   : > { %2412 = vmatmul.mubr.msk.bf16.vlgmr.msra.gmra.mxu0 %vm1190_vm4, %v1331_v32  ;;  %2416 = vmatpush3.bf16.msra.mxu1 %v1387_v36  ;;  %v2658_v36 = vld [vmem:[%s3660_s11] sm:$0xff]  }
 0x405   : > { %v2689_v37 = vpop.eup %2688  ;;  %2422 = vmatpush3.bf16.msra.mxu0 %v1437_v35  ;;  %2427 = vmatprep.subr.bf16.mxu1 %v3008_v0 }
 0x406   : > { %v1274_v39 = vmul.f32 %v2689_v37, %v2675_v6  ;;  %2423 = vmatprep.mubr.msk.bf16.mxu0 %vm3009_vm0, %v3008_v0  ;;  %2433 = vmatprep.subr.bf16.mxu0 %v3008_v0  ;;  %v2691_v44 = vpop.eup %2690  ;;  %v2659_v37 = vld [vmem:[%s3660_s11 + $0x8] sm:$0xff]  }
 0x407   : > { %v1275_v47 = vmul.f32 %v2691_v44, %v3462_v5 }
 0x408   : > { %v1280_v40 = vpack.c.bf16 %v1274_v39, %v1273_v38  ;;  %v2660_v38 = vld [vmem:[%s3660_s11 + $0x10] sm:$0xff]   ;;  %v2661_v39 = vld [vmem:[%s3660_s11 + $0x18] sm:$0xff]  }
 0x40a   : > { %2418 = vmatmul.mubr.msk.bf16.vlgmr.msra.gmra.mxu1 %vm1190_vm4, %v1280_v40  ;;  %v1430_v43 = vrot.slane %v1280_v40, 4  ;;  %v2662_v40 = vld [vmem:[%s3658_s9 + $0x18] sm:$0xff]  }
 0x40b   : > { %2428 = vmatpush3.bf16.msra.mxu1 %v1484_v42  ;;  %2429 = vmatprep.mubr.msk.bf16.mxu1 %vm3009_vm0, %v3008_v0 }
 0x40c   : > { %2424 = vmatmul.mubr.msk.bf16.vlgmr.msra.gmra.mxu0 %vm1190_vm4, %v1430_v43  ;;  %2439 = vmatprep.subr.bf16.mxu1 %v3008_v0  ;;  %v2693_v46 = vpop.eup %2692 }
 0x40d   : > { %2434 = vmatpush3.bf16.msra.mxu0 %v1534_v45  ;;  %2435 = vmatprep.mubr.msk.bf16.mxu0 %vm3009_vm0, %v3008_v0  ;;  %v1276_v48 = vmul.f32 %v2693_v46, %v3467_v9  ;;  %v2664_v46 = vld [vmem:[%s3658_s9 + $0x8] sm:$0xff]  }
 0x40e   : > { %2445 = vmatprep.subr.bf16.mxu0 %v3008_v0 }
 0x40f   : > { %v1281_v49 = vpack.c.bf16 %v1276_v48, %v1275_v47 }
 0x411   : > { %v1527_v50 = vrot.slane %v1281_v49, 4 }
 0x412   : > { %2430 = vmatmul.mubr.msk.bf16.vlgmr.msra.gmra.mxu1 %vm1190_vm4, %v1281_v49 }
 0x413   : > { %2441 = vmatprep.mubr.msk.bf16.mxu1 %vm3009_vm0, %v3008_v0 }
 0x414   : > { %2436 = vmatmul.mubr.msk.bf16.vlgmr.msra.gmra.mxu0 %vm1190_vm4, %v1527_v50 }
 0x415   : > { %2447 = vmatprep.mubr.msk.bf16.mxu0 %vm3009_vm0, %v3008_v0 }
 0x42f   : > { %v1259_v51 = vpop.xlane.xlu1 %1258 }
 0x430   : > { %2694 = vrcp.f32 %v1259_v51 }
 0x433   : > { %v1627_v52 = vpop.permute.xlu1 %1626  ;;  %v1262_v54 = vpop.xlane.xlu0 %1261 }
 0x434   : > { %v1632_v53 = vsel %vm1286_vm3, %v1627_v52, 0  ;;  %2696 = vrcp.f32 %v1262_v54  ;;  %v2665_v52 = vld [vmem:[%s3658_s9] sm:$0xff]  }
 0x435   : > { %2446 = vmatpush3.bf16.msra.mxu0 %v1632_v53 }
 0x436   : > { %2463 = vmatprep.subr.bf16.mxu0 %v3008_v0 }
 0x437   : > { %v1577_v55 = vpop.permute.xlu0 %1576 }
 0x438   : > { %v1582_v56 = vsel %vm1286_vm3, %v1577_v55, 0 }
 0x439   : > { %2440 = vmatpush3.bf16.msra.mxu1 %v1582_v56 }
 0x43a   : > { %2451 = vmatprep.subr.bf16.mxu1 %v3008_v0 }
 0x43d   : > { %v2695_v58 = vpop.eup %2694 }
 0x43e   : > { %v1277_v60 = vmul.f32 %v2695_v58, %v3479_v17 }
 0x441   : > { %v2697_v59 = vpop.eup %2696 }
 0x442   : > { %v1278_v61 = vmul.f32 %v2697_v59, %v3483_v19 }
 0x444   : > { %v1282_v62 = vpack.c.bf16 %v1278_v61, %v1277_v60 }
 0x446   : > { %2442 = vmatmul.mubr.msk.bf16.vlgmr.msra.gmra.mxu1 %vm1190_vm4, %v1282_v62  ;;  %v1625_v63 = vrot.slane %v1282_v62, 4 }
 0x447   : > { %2459 = vmatprep.mubr.msk.bf16.mxu1 %vm3009_vm0, %v3008_v0 }
 0x448   : > { %2448 = vmatmul.mubr.msk.bf16.vlgmr.msra.gmra.mxu0 %vm1190_vm4, %v1625_v63 }
 0x449   : > { %2471 = vmatprep.mubr.msk.bf16.mxu0 %vm3009_vm0, %v3008_v0 }
 0x4c2   : > { %v1324_v1 = vpop.f32.mrf.mxu1 }
 0x4c4   : > { %v2407_v2 = vpop.f32.mrf.mxu1  ;;  %v1375_v3 = vpop.f32.mrf.mxu0 }
 0x4c5   : > { %v3531_v4 = vpack.c.bf16 %v1375_v3, %v1324_v1 }
 0x4c6   : > { %v1327_v5 = vpop.f32.mrf.mxu1  ;;  %v2413_v6 = vpop.f32.mrf.mxu0 }
 0x4c8   : > { %v2408_v7 = vpop.f32.mrf.mxu1  ;;  %v1378_v8 = vpop.f32.mrf.mxu0 }
 0x4ca   : > { %v2414_v9 = vpop.f32.mrf.mxu0  ;;  %v1423_v10 = vpop.f32.mrf.mxu1 }
 0x4cc   : > { %v2419_v11 = vpop.f32.mrf.mxu1  ;;  %v1473_v12 = vpop.f32.mrf.mxu0 }
 0x4cd   : > { %v1675_v13 = vpack.c.bf16 %v1473_v12, %v1423_v10 }
 0x4ce   : > { %v1426_v14 = vpop.f32.mrf.mxu1  ;;  %v2425_v15 = vpop.f32.mrf.mxu0 }
 0x4d0   : > { %v2420_v16 = vpop.f32.mrf.mxu1  ;;  %v1476_v17 = vpop.f32.mrf.mxu0 }
 0x4d1   : > { %v2251_v16 = vld [vmem:[%s3659_s10] ss:$0 sm:$0xff] }
 0x4d2   : > { %v2426_v18 = vpop.f32.mrf.mxu0  ;;  %v1520_v19 = vpop.f32.mrf.mxu1 }
 0x4d4   : > { %v2431_v57 = vpop.f32.mrf.mxu1  ;;  %v1570_v20 = vpop.f32.mrf.mxu0 }
 0x4d5   : > { %v1676_v34 = vpack.c.bf16 %v1570_v20, %v1520_v19 }
 0x4d6   : > { %v1523_v21 = vpop.f32.mrf.mxu1  ;;  %v2437_v22 = vpop.f32.mrf.mxu0 }
 0x4d8   : > { %v2432_v23 = vpop.f32.mrf.mxu1  ;;  %v1573_v24 = vpop.f32.mrf.mxu0 }
 0x4da   : > { %v2438_v25 = vpop.f32.mrf.mxu0 }
 0x506   : > { %v1618_v26 = vpop.f32.mrf.mxu1 }
 0x508   : > { %v2443_v27 = vpop.f32.mrf.mxu1  ;;  %v1668_v28 = vpop.f32.mrf.mxu0 }
 0x509   : > { %v1677_v29 = vpack.c.bf16 %v1668_v28, %v1618_v26 }
 0x50a   : > { %v1621_v30 = vpop.f32.mrf.mxu1  ;;  %v2449_v31 = vpop.f32.mrf.mxu0 }
 0x50b   : > { %2452 = vmatpush3.bf16.msra.mxu1 %v1677_v29  ;;  %2464 = vmatpush3.bf16.msra.mxu0 %v1677_v29 }
 0x50c   : > { %v2444_v32 = vpop.f32.mrf.mxu1  ;;  %v1671_v33 = vpop.f32.mrf.mxu0  ;;  %2453 = vmatprep.subr.bf16.mxu1 %v3008_v0  ;;  %2465 = vmatprep.subr.bf16.mxu0 %v3008_v0 }
 0x50e   : > { %v2450_v35 = vpop.f32.mrf.mxu0 }
 0x50f   : > { %2454 = vmatpush3.bf16.msra.mxu1 %v1676_v34  ;;  %2466 = vmatpush3.bf16.msra.mxu0 %v1676_v34 }
 0x510   : > { %2455 = vmatprep.subr.bf16.mxu1 %v3008_v0  ;;  %2467 = vmatprep.subr.bf16.mxu0 %v3008_v0 }
 0x513   : > { %2456 = vmatpush3.bf16.msra.mxu1 %v1675_v13  ;;  %2468 = vmatpush3.bf16.msra.mxu0 %v1675_v13 }
 0x514   : > { %2457 = vmatprep.subr.bf16.mxu1 %v3008_v0  ;;  %2469 = vmatprep.subr.bf16.mxu0 %v3008_v0 }
 0x517   : > { %2458 = vmatpush3.bf16.msra.mxu1 %v3531_v4  ;;  %2470 = vmatpush3.bf16.msra.mxu0 %v3531_v4 }
 0x518   : > { %2475 = vmatprep.subr.bf16.mxu1 %v3008_v0  ;;  %2487 = vmatprep.subr.bf16.mxu0 %v3008_v0 }
 0x51a   : > { %2460 = vmatmul.mubr.msk.bf16.vlgmr.msra.gmra.mxu1 %vm1685_vm5, %v2658_v36  ;;  %2472 = vmatmul.mubr.msk.bf16.vlgmr.msra.gmra.mxu0 %vm1685_vm5, %v2659_v37 }
 0x51b   : > { %2476 = vmatpush3.bf16.msra.mxu1 %v1677_v29  ;;  %2488 = vmatpush3.bf16.msra.mxu0 %v1677_v29 }
 0x51c   : > { %2477 = vmatprep.subr.bf16.mxu1 %v3008_v0  ;;  %2489 = vmatprep.subr.bf16.mxu0 %v3008_v0 }
 0x51d   : > { %2483 = vmatprep.mubr.msk.bf16.mxu1 %vm3009_vm0, %v3008_v0  ;;  %2495 = vmatprep.mubr.msk.bf16.mxu0 %vm3009_vm0, %v3008_v0 }
 0x51f   : > { %2478 = vmatpush3.bf16.msra.mxu1 %v1676_v34  ;;  %2490 = vmatpush3.bf16.msra.mxu0 %v1676_v34 }
 0x520   : > { %2479 = vmatprep.subr.bf16.mxu1 %v3008_v0  ;;  %2491 = vmatprep.subr.bf16.mxu0 %v3008_v0 }
 0x523   : > { %2480 = vmatpush3.bf16.msra.mxu1 %v1675_v13  ;;  %2492 = vmatpush3.bf16.msra.mxu0 %v1675_v13 }
 0x524   : > { %2481 = vmatprep.subr.bf16.mxu1 %v3008_v0  ;;  %2493 = vmatprep.subr.bf16.mxu0 %v3008_v0 }
 0x527   : > { %2482 = vmatpush3.bf16.msra.mxu1 %v3531_v4  ;;  %2494 = vmatpush3.bf16.msra.mxu0 %v3531_v4 }
 0x528   : > { %2499 = vmatprep.subr.bf16.mxu1 %v3008_v0 }
 0x52a   : > { %2484 = vmatmul.mubr.msk.bf16.vlgmr.msra.gmra.mxu1 %vm1685_vm5, %v2660_v38  ;;  %2496 = vmatmul.mubr.msk.bf16.vlgmr.msra.gmra.mxu0 %vm1685_vm5, %v2661_v39 }
 0x52b   : > { %2507 = vmatprep.mubr.msk.bf16.mxu1 %vm3009_vm0, %v3008_v0  ;;  %2500 = vmatpush3.bf16.msra.mxu1 %v2662_v40 }
 0x52c   : > { %2501 = vmatprep.subr.bf16.mxu1 %v3008_v0 }
 0x52f   : > { %2502 = vmatpush3.bf16.msra.mxu1 %v2663_v41 }
 0x530   : > { %2503 = vmatprep.subr.bf16.mxu1 %v3008_v0 }
 0x533   : > { %2504 = vmatpush3.bf16.msra.mxu1 %v2664_v46 }
 0x534   : > { %2505 = vmatprep.subr.bf16.mxu1 %v3008_v0 }
 0x537   : > { %2506 = vmatpush3.bf16.msra.mxu1 %v2665_v52 }
 0x5da   : > { %v1723_v42 = vpop.f32.mrf.mxu1  ;;  %v1775_v43 = vpop.f32.mrf.mxu0 }
 0x5dc   : > { %v2461_v44 = vpop.f32.mrf.mxu1  ;;  %v2473_v45 = vpop.f32.mrf.mxu0 }
 0x5de   : > { %v1726_v47 = vpop.f32.mrf.mxu1  ;;  %v1778_v48 = vpop.f32.mrf.mxu0 }
 0x5df   : > { %v2637_v49 = vpack.i.bf16 %v1778_v48, %v1775_v43 }
 0x5e0   : > { %v2462_v50 = vpop.f32.mrf.mxu1  ;;  %v2474_v51 = vpop.f32.mrf.mxu0 }
 0x5e1   : > { %2638 = vrot.lane.b32.xlu0 %v2637_v49, %s3013_s7  ;;  %s2916_s7 = scalar_lea.vmem %s2915_s18, 512 }
 0x5e2   : > { %p2918_p3 = scmp.lt.s32.totalorder %s2916_s7, %s2910_s27 }
 0x5e4   : > { %p2919_p7 = por %p2918_p3, %p2917_p2 }
 0x5e6   : > { %p2920_p6 = pnand %p2919_p7, %p2913_p12 }
 0x5ea   : > { %v1827_v53 = vpop.f32.mrf.mxu1  ;;  %v1879_v54 = vpop.f32.mrf.mxu0 }
 0x5ec   : > { %v2485_v55 = vpop.f32.mrf.mxu1  ;;  %v2497_v56 = vpop.f32.mrf.mxu0 }
 0x5ee   : > { %v1830_v58 = vpop.f32.mrf.mxu1  ;;  %v1882_v59 = vpop.f32.mrf.mxu0 }
 0x5ef   : > { %v2642_v60 = vpack.i.bf16 %v1830_v58, %v1827_v53  ;;  %v2647_v61 = vpack.i.bf16 %v1882_v59, %v1879_v54 }
 0x5f0   : > { %v2486_v62 = vpop.f32.mrf.mxu1  ;;  %v2498_v63 = vpop.f32.mrf.mxu0 }
 0x5f1   : > { %2643 = vrot.lane.b32.xlu1 %v2642_v60, %s3014_s16  ;;  %2648 = vrot.lane.b32.xlu0 %v2647_v61, %s3015_s12 }
 0x653   : > { %v2639_v0 = vpop.permute.xlu0 %2638 }
 0x654   : > { %v2641_v1 = vunpack.i.h.bf16 %v2639_v0  ;;  %v2640_v2 = vunpack.i.l.bf16 %v2639_v0 }
 0x656   : > { %v1911_v9 = vsel %vm793_vm2, %v1726_v47, %v2641_v1  ;;  %v1910_v10 = vsel %vm793_vm2, %v1723_v42, %v2640_v2 }
 0x663   : > { %v2644_v3 = vpop.permute.xlu1 %2643  ;;  %v2649_v4 = vpop.permute.xlu0 %2648 }
 0x664   : > { %v2646_v5 = vunpack.i.h.bf16 %v2644_v3  ;;  %v2645_v6 = vunpack.i.l.bf16 %v2644_v3  ;;  %v2651_v7 = vunpack.i.h.bf16 %v2649_v4  ;;  %v2650_v8 = vunpack.i.l.bf16 %v2649_v4 }
 0x666   : > { %v1912_v11 = vsel %vm611_vm1, %v1910_v10, %v2645_v6  ;;  %v1913_v12 = vsel %vm611_vm1, %v1911_v9, %v2646_v5 }
 0x667   : > { %v1916_v13 = vsel %vm1914_vm6, %v1913_v12, %v2651_v7  ;;  %v1915_v14 = vsel %vm1914_vm6, %v1912_v11, %v2650_v8 }
 0x668   : > { %v1917_v15 = vpack.c.bf16 %v1916_v13, %v1915_v14 }
 0x66a   : > { %2508 = vmatmul.mubr.msk.bf16.vlgmr.msra.gmra.mxu1 %vm1685_vm5, %v1917_v15 }
 0x72a   : > { %v1994_v17 = vpop.f32.mrf.mxu1 }
 0x72b   : > { %v1995_v18 = vadd.f32 %v2251_v16, %v1994_v17 }
 0x72c   : > { %v2509_v19 = vpop.f32.mrf.mxu1 }
 0x72d   : > { %2001 = vst.msk [vmem:[%s568_s8] sm:$0xff] %vm611_vm1, %v1995_v18 }
 0x72e   : > { %v1997_v57 = vpop.f32.mrf.mxu1 }
 0x72f   : > { %v1998_v20 = vadd.f32 %v2251_v16, %v1997_v57 }
 0x730   : > { %v2510_v21 = vpop.f32.mrf.mxu1 }
 0x731   : > { %2002 = vst.msk [vmem:[%s568_s8 + $0x8] sm:$0xff] %vm611_vm1, %v1998_v20 }
 0x732   : > { %2923 = shalt.err (!%p2920_p6)
}
 0x733   : > { %s2924_s1 = scalar_lea.hbm %s3605_s19, 256  ;;  %s2928_s12 = scalar_lea.hbm %s3704_s30, 512 }
 0x734   : > { %p2925_p0 = scmp.ne.s32.totalorder %s3605_s19, %s2924_s1  ;;  %p2929_p11 = scmp.lt.s32.totalorder %s3605_s19, %s3704_s30 }
 0x735   : > { %p2930_p13 = scmp.lt.s32.totalorder %s2928_s12, %s2924_s1 }
 0x736   : > { %p2926_p9 = pnand %p2925_p0, %p3705_p1 }
 0x737   : > { %p2931_p5 = por %p2930_p13, %p2929_p11 }
 0x738   : > { %p2927_p10 = pneg %p2926_p9 }
 0x73a   : > { %p2932_p8 = pnand %p2931_p5, %p2927_p10 }
 0x73c   : > { %2935 = shalt.err (!%p2932_p8)
}
 0x73d   : > { %s3017_s8 = smov 128   ;;  %s3018_s6 = smov 8  }
 0x73e   : > { %2539 = dma.vmem_to_hbm [thread:$0]  (%p3705_p1), %s3600_s28, 256, %s3605_s19, %s2004_s3, %s3017_s8, %s3017_s8, %s3018_s6  }
 0x73f PF: > { %s2032_s25 = sand.u32 1, %s2982_s21   ;;  %p3706_p4 = scmp.ne.s32.totalorder %s3691_s14, 0 }
 0x740   : > { %p3707_p12 = scmp.ge.s32.totalorder %s2994_s24, 2  ;;  %s2033_s20 = scalar_lea.sflag [#allocation4], %s2032_s25 }
 0x742   : > { %p2568_p2 = pnand %p3707_p12, %p3706_p4 }
 0x744   : > { %p2569_p3 = pneg %p2568_p2 }
 0x746   : > { %2977 = dma.done.wait (%p2569_p3), %s2033_s20, 256  }
 0x747   : > { %2979 = vsyncadd (%p2569_p3), %s2033_s20, 4294967040  ;;  %s3708_s27 = sld [smem:[#allocation24_spill]]  ;;  %p31_p7 = scmp.ge.s32.totalorder %s3190_s13, 4  }
 0x748   : > { %s3709_s21 = smov %s2986_s22  ;;  %s3710_s22 = smov %s2990_s23 }
 0x749   : > { %s3712_s24 = smov %s3190_s13  ;;  %33 = sbr.rel (!%p31_p7) target bundleno = 19 (0x13), region = 156 }
 0x74d   : > { %s3711_s23 = smov %s3708_s27 }
 0x74e   :  { %2038 = vsyncpa [#allocation3], 1 }
 0x74f   :  { %2040 = vsyncpa [#allocation3 + $0x1], 1 }
 0x750   :  { %2041 = vsyncpa [#allocation6], 1 }
 0x751   :  { %2043 = vsyncpa [#allocation6 + $0x1], 1 }
 0x752   :  { %2044 = vsyncpa [#allocation9], 1 }
 0x753   :  { %2045 = vsyncpa [#allocation12], 1 }
 0x754   :  { %2046 = vsyncpa [#allocation15], 1 }
 0x755   :  { %2047 = vsyncpa [#allocation4], 1 }
 0x756   :  { %2049 = vsyncpa [#allocation4 + $0x1], 1 }

</bundles_post_ra>
